<compile_context>
chip_gen: v7x
topology: tpu7x:2x2x1
jax: 0.10.0
libtpu: 0.0.40
codegen_flags: <defaults>
</compile_context>

<pallas_src>
import jax
import jax.numpy as jnp
from jax.experimental import pallas as pl
from jax.experimental.pallas import tpu as pltpu


# ----------------------------------------------------------------------------
# in-kernel helpers
# ----------------------------------------------------------------------------

def _bn_relu_val(x, gamma, beta, eps=1e-5):
    """Training-mode BatchNorm (per-row channel, stats over lanes) + ReLU.

    x: (C, M) f32, gamma/beta: (C, 1) f32.  Two-pass centered variance.
    rsqrt runs on the EUP slot (free relative to VPU/MXU).
    """
    m = x.shape[1]
    mean = jnp.sum(x, axis=1, keepdims=True) * (1.0 / m)
    xc = x - mean
    var = jnp.sum(xc * xc, axis=1, keepdims=True) * (1.0 / m)   # biased var
    scale = gamma * jax.lax.rsqrt(var + eps)
    return jnp.maximum(xc * scale + beta, 0.0)


# ----------------------------------------------------------------------------
# Pallas kernels
# ----------------------------------------------------------------------------

def _conv0_bn_relu_kernel(cols_ref, w_ref, g_ref, b_ref, o_ref):
    # y = W0 @ cols  (conv0 as matmul over 7*Cin taps), then BN0 + ReLU0.
    y = jnp.dot(w_ref[...], cols_ref[...].astype(jnp.bfloat16),
                preferred_element_type=jnp.float32)
    o_ref[...] = _bn_relu_val(y, g_ref[...], b_ref[...])


def _bn_relu_kernel(x_ref, g_ref, b_ref, o_ref):
    # norm5 + final ReLU.
    o_ref[...] = _bn_relu_val(x_ref[...], g_ref[...], b_ref[...])


def _linear_kernel(x_ref, w_ref, b_ref, o_ref):
    # classifier: y = x @ W + b  (W pre-transposed / pre-cast at init).
    o_ref[...] = jnp.dot(x_ref[...].astype(jnp.bfloat16), w_ref[...],
                         preferred_element_type=jnp.float32) + b_ref[...]


def make_block_kernel(c_in, num_layers, growth, trans_cout):
    """Fused dense-block (+ optional transition BN/ReLU/1x1-conv) kernel.

    Ref order: x, mask_prev, mask_next,
               [n1g, n1b, w1, n2g, n2b, w2] * num_layers,
               [trans_g, trans_b, trans_w]?,
               out_ref, [slab scratch]?
    """
    has_trans = trans_cout is not None

    def kernel(*refs):
        it = iter(refs)
        x_ref = next(it)
        mprev_ref = next(it)
        mnext_ref = next(it)
        layers = [tuple(next(it) for _ in range(6)) for _ in range(num_layers)]
        if has_trans:
            tg_ref = next(it)
            tb_ref = next(it)
            tw_ref = next(it)
        out_ref = next(it)
        slab = next(it) if has_trans else out_ref   # feature slab lives in VMEM

        # seed the slab with the block input (rows = channels)
        slab[0:c_in, :] = x_ref[...]
        mask_p = mprev_ref[...] > 0.5               # (1, M) bool: pos != 0
        mask_n = mnext_ref[...] > 0.5               # (1, M) bool: pos != L-1

        for j in range(num_layers):
            g1, b1, w1, g2, b2, w2 = layers[j]
            cin = c_in + j * growth

            xj = slab[0:cin, :]                               # (cin, M) f32
            # norm1 + relu1 + conv1 (1x1)
            a1 = _bn_relu_val(xj, g1[...], b1[...])
            h = jnp.dot(w1[...], a1.astype(jnp.bfloat16),     # (mid, M)
                        preferred_element_type=jnp.float32)
            # norm2 + relu2
            a2 = _bn_relu_val(h, g2[...], b2[...])            # (mid, M) f32

            # conv2 (k=3, pad=1): shifted copies via XLU roll, zero-padded at
            # per-sequence boundaries with masks (select, not multiply, so any
            # padding-lane garbage cannot leak through as NaN).
            m = a2.shape[1]
            prev = jnp.where(mask_p, pltpu.roll(a2, shift=1, axis=1), 0.0)
            nxt = jnp.where(mask_n, pltpu.roll(a2, shift=m - 1, axis=1), 0.0)
            taps = jnp.concatenate([prev, a2, nxt], axis=0)   # (3*mid, M)
            new = jnp.dot(w2[...], taps.astype(jnp.bfloat16), # (growth, M)
                          preferred_element_type=jnp.float32)

            # in-place slice write: torch.cat([x, new], 1) without HBM concat
            slab[cin:cin + growth, :] = new

        if has_trans:
            # transition: norm + relu + 1x1 conv (pooling done outside)
            af = _bn_relu_val(slab[...], tg_ref[...], tb_ref[...])
            out_ref[...] = jnp.dot(tw_ref[...], af.astype(jnp.bfloat16),
                                   preferred_element_type=jnp.float32)

    return kernel


# ----------------------------------------------------------------------------
# pallas_call wrappers
# ----------------------------------------------------------------------------

def _vmem():
    return pl.BlockSpec(memory_space=pltpu.MemorySpace.VMEM)


_CP = pltpu.CompilerParams(vmem_limit_bytes=32 * 1024 * 1024)


def conv0_bn_relu(cols, w, g, b):
    c0, m = w.shape[0], cols.shape[1]
    return pl.pallas_call(
        _conv0_bn_relu_kernel,
        out_shape=jax.ShapeDtypeStruct((c0, m), jnp.float32),
        in_specs=[_vmem()] * 4, out_specs=_vmem(),
        compiler_params=_CP,
    )(cols, w, g, b)


def bn_relu(x, g, b):
    return pl.pallas_call(
        _bn_relu_kernel,
        out_shape=jax.ShapeDtypeStruct(x.shape, jnp.float32),
        in_specs=[_vmem()] * 3, out_specs=_vmem(),
        compiler_params=_CP,
    )(x, g, b)


def linear(x, w, b):
    return pl.pallas_call(
        _linear_kernel,
        out_shape=jax.ShapeDtypeStruct((x.shape[0], w.shape[1]), jnp.float32),
        in_specs=[_vmem()] * 3, out_specs=_vmem(),
        compiler_params=_CP,
    )(x, w, b)


def dense_block(x, mask_p, mask_n, layers, trans):
    c_in, m = x.shape
    num_layers = len(layers)
    growth = layers[0]["w2"].shape[0]
    c_final = c_in + num_layers * growth
    has_trans = trans is not None
    c_out = trans["w"].shape[0] if has_trans else c_final

    kernel = make_block_kernel(c_in, num_layers, growth,
                               c_out if has_trans else None)

    inputs = [x, mask_p, mask_n]
    for lp in layers:
        inputs += [lp["n1g"], lp["n1b"], lp["w1"],
                   lp["n2g"], lp["n2b"], lp["w2"]]
    if has_trans:
        inputs += [trans["g"], trans["b"], trans["w"]]

    scratch = [pltpu.VMEM((c_final, m), jnp.float32)] if has_trans else []

    return pl.pallas_call(
        kernel,
        out_shape=jax.ShapeDtypeStruct((c_out, m), jnp.float32),
        in_specs=[_vmem()] * len(inputs),
        out_specs=_vmem(),
        scratch_shapes=scratch,
        compiler_params=_CP,
    )(*inputs)


# ----------------------------------------------------------------------------
# XLA glue: conv0 column build, pooling (downsampling), boundary masks
# ----------------------------------------------------------------------------

def _conv0_cols(x_ncl, k=7, stride=2, pad=3):
    """x: (B, C, L) -> cols (k*C, B*Lout), tap-major / channel-minor rows."""
    b, c, l = x_ncl.shape
    xp = jnp.pad(x_ncl, ((0, 0), (0, 0), (pad, pad)))
    lout = (l + 2 * pad - k) // stride + 1
    taps = [xp[:, :, t:t + stride * (lout - 1) + 1:stride] for t in range(k)]
    cols = jnp.transpose(jnp.stack(taps, axis=0), (0, 2, 1, 3))  # (k,C,B,Lout)
    return cols.reshape(k * c, b * lout), lout


def _maxpool_cm(h, b, l, k=3, stride=2, pad=1):
    c = h.shape[0]
    hr = h.reshape(c, b, l)
    hp = jnp.pad(hr, ((0, 0), (0, 0), (pad, pad)), constant_values=-jnp.inf)
    lout = (l + 2 * pad - k) // stride + 1
    win = jnp.stack([hp[:, :, t:t + stride * (lout - 1) + 1:stride]
                     for t in range(k)], axis=0)
    return jnp.max(win, axis=0).reshape(c, b * lout), lout


def _avgpool2_cm(h, b, l):
    c = h.shape[0]
    lout = l // 2
    hr = h.reshape(c, b, l)[:, :, :2 * lout].reshape(c, b, lout, 2)
    return jnp.mean(hr, axis=-1).reshape(c, b * lout), lout


def _boundary_masks(b, l):
    pos = jnp.arange(b * l, dtype=jnp.int32) % l
    mp = (pos != 0).astype(jnp.float32).reshape(1, b * l)
    mn = (pos != l - 1).astype(jnp.float32).reshape(1, b * l)
    return mp, mn


# ----------------------------------------------------------------------------
# parameter init (matmul-ready layout; bf16 weights, f32 BN params)
# ----------------------------------------------------------------------------

def init_densenet_params(key, in_len, in_channels=80, growth_rate=4,
                         block_config=(2, 2), num_init_features=16, bn_size=2,
                         compression_rate=0.5, num_classes=16):
    keys = iter(jax.random.split(key, 1024))

    def conv_w(shape, fan_in):                  # kaiming_normal_, fan_in, gain sqrt(2)
        std = (2.0 / fan_in) ** 0.5
        return (jax.random.normal(next(keys), shape, jnp.float32) * std
                ).astype(jnp.bfloat16)

    p = {}
    c0 = num_init_features
    p["conv0_w"] = conv_w((c0, 7 * in_channels), in_channels * 7)
    p["norm0_g"] = jnp.ones((c0, 1), jnp.float32)
    p["norm0_b"] = jnp.zeros((c0, 1), jnp.float32)

    l = (in_len + 2 * 3 - 7) // 2 + 1           # conv0 (k=7, s=2, p=3)
    l = (l + 2 * 1 - 3) // 2 + 1                # maxpool0 (k=3, s=2, p=1)

    num_features = c0
    blocks = []
    for i, num_layers in enumerate(block_config):
        layers = []
        for j in range(num_layers):
            cin = num_features + j * growth_rate
            mid = bn_size * growth_rate
            layers.append(dict(
                n1g=jnp.ones((cin, 1), jnp.float32),
                n1b=jnp.zeros((cin, 1), jnp.float32),
                w1=conv_w((mid, cin), cin * 1),
                n2g=jnp.ones((mid, 1), jnp.float32),
                n2b=jnp.zeros((mid, 1), jnp.float32),
                w2=conv_w((growth_rate, 3 * mid), mid * 3),
            ))
        num_features += num_layers * growth_rate
        trans = None
        if i != len(block_config) - 1:
            nout = int(num_features * compression_rate)
            trans = dict(
                g=jnp.ones((num_features, 1), jnp.float32),
                b=jnp.zeros((num_features, 1), jnp.float32),
                w=conv_w((nout, num_features), num_features),
            )
            num_features = nout
            l = l // 2                           # AvgPool1d(k=2, s=2)
        blocks.append(dict(layers=layers, trans=trans))
    p["blocks"] = blocks

    p["norm5_g"] = jnp.ones((num_features, 1), jnp.float32)
    p["norm5_b"] = jnp.zeros((num_features, 1), jnp.float32)

    lf = l - 6                                   # avg_pool1d(k=7, s=1)
    flat = num_features * lf
    p["fc_w"] = (jax.random.normal(next(keys), (flat, num_classes), jnp.float32)
                 * (1.0 / flat ** 0.5)).astype(jnp.bfloat16)   # pre-transposed
    p["fc_b"] = jnp.zeros((1, num_classes), jnp.float32)
    return p


# ----------------------------------------------------------------------------
# forward pass
# ----------------------------------------------------------------------------

def densenet_forward(params, x_ncl):
    # x_ncl: (B, 80, L)  (PyTorch NCL convention)
    x = x_ncl.astype(jnp.float32)
    b = x.shape[0]

    # conv0 + norm0 + relu0 (single fused kernel); im2col of the raw input
    # stays in XLA (one-time cost).
    cols, l = _conv0_cols(x, k=7, stride=2, pad=3)
    h = conv0_bn_relu(cols, params["conv0_w"],
                      params["norm0_g"], params["norm0_b"])    # (C0, B*L)

    # pool0: MaxPool1d(k=3, s=2, p=1)
    h, l = _maxpool_cm(h, b, l, k=3, stride=2, pad=1)

    # dense blocks (each block + its transition = one fused kernel)
    for blk in params["blocks"]:
        mp, mn = _boundary_masks(b, l)
        h = dense_block(h, mp, mn, blk["layers"], blk["trans"])
        if blk["trans"] is not None:
            h, l = _avgpool2_cm(h, b, l)                        # AvgPool1d(2,2)

    # norm5 + final relu
    h = bn_relu(h, params["norm5_g"], params["norm5_b"])        # (C5, B*L)

    # avg_pool1d(k=7, s=1), flatten in torch's (B, C, L) order
    c5 = h.shape[0]
    hr = jnp.transpose(h.reshape(c5, b, l), (1, 0, 2))          # (B, C5, L)
    lf = l - 6
    win = jnp.stack([hr[:, :, t:t + lf] for t in range(7)], axis=0)
    flat = jnp.mean(win, axis=0).reshape(b, c5 * lf)            # (B, C5*Lf)

    # classifier: Linear (weights pre-transposed / bf16 at init)
    return linear(flat, params["fc_w"], params["fc_b"])         # (B, classes)


# ----------------------------------------------------------------------------
# demo
# ----------------------------------------------------------------------------

if __name__ == "__main__":
    key = jax.random.PRNGKey(0)
    k_param, k_input = jax.random.split(key)

    # small but structurally faithful configuration
    B, C_IN, L_IN = 2, 80, 64
    cfg = dict(growth_rate=4, block_config=(2, 2), num_init_features=16,
               bn_size=2, compression_rate=0.5, num_classes=16)

    params = init_densenet_params(k_param, in_len=L_IN, in_channels=C_IN, **cfg)
    x = jax.random.normal(k_input, (B, C_IN, L_IN), jnp.float32)

    fwd = jax.jit(densenet_forward)
    out = jax.block_until_ready(fwd(params, x))

    assert out.shape == (B, cfg["num_classes"]), out.shape
    assert bool(jnp.all(jnp.isfinite(out)))
    print("KERNEL_OK")
</pallas_src>

<mosaic_0001>
module attributes {stable_mosaic.version = 11 : i64} {
  func.func @_conv0_bn_relu_kernel(%arg0: memref<560x64xf32, #tpu.memory_space<vmem>>, %arg1: memref<16x560xbf16, #tpu.memory_space<vmem>>, %arg2: memref<16x1xf32, #tpu.memory_space<vmem>>, %arg3: memref<16x1xf32, #tpu.memory_space<vmem>>, %arg4: memref<16x64xf32, #tpu.memory_space<vmem>>) attributes {dimension_semantics = [], scalar_prefetch = 0 : i64, scratch_operands = 0 : i64, tpu.core_type = #tpu.core_type<tc>} {
    %c0 = arith.constant 0 : index
    %c0_0 = arith.constant 0 : index
    %0 = vector.load %arg1[%c0, %c0_0] : memref<16x560xbf16, #tpu.memory_space<vmem>>, vector<16x560xbf16>
    %c0_1 = arith.constant 0 : index
    %c0_2 = arith.constant 0 : index
    %1 = vector.load %arg0[%c0_1, %c0_2] : memref<560x64xf32, #tpu.memory_space<vmem>>, vector<560x64xf32>
    %2 = arith.truncf %1 : vector<560x64xf32> to vector<560x64xbf16>
    %cst = arith.constant dense<0.000000e+00> : vector<16x64xf32>
    %3 = tpu.matmul %0, %2, %cst {dimension_numbers = #tpu.dot_dimension_numbers<[1], [0], [0], [1], [0, 0, 1, 1], [], []>} : vector<16x560xbf16>, vector<560x64xbf16>, vector<16x64xf32> -> vector<16x64xf32>
    %c0_3 = arith.constant 0 : index
    %c0_4 = arith.constant 0 : index
    %4 = vector.load %arg2[%c0_3, %c0_4] : memref<16x1xf32, #tpu.memory_space<vmem>>, vector<16x1xf32>
    %c0_5 = arith.constant 0 : index
    %c0_6 = arith.constant 0 : index
    %5 = vector.load %arg3[%c0_5, %c0_6] : memref<16x1xf32, #tpu.memory_space<vmem>>, vector<16x1xf32>
    %cst_7 = arith.constant dense<0.000000e+00> : vector<16xf32>
    %6 = vector.multi_reduction <add>, %3, %cst_7 [1] : vector<16x64xf32> to vector<16xf32>
    %7 = vector.shape_cast %6 : vector<16xf32> to vector<16x1xf32>
    %cst_8 = arith.constant 1.562500e-02 : f32
    %8 = vector.broadcast %cst_8 : f32 to vector<16x1xf32>
    %9 = arith.mulf %7, %8 : vector<16x1xf32>
    %10 = vector.broadcast %9 : vector<16x1xf32> to vector<16x64xf32>
    %11 = arith.subf %3, %10 : vector<16x64xf32>
    %12 = arith.mulf %11, %11 : vector<16x64xf32>
    %cst_9 = arith.constant dense<0.000000e+00> : vector<16xf32>
    %13 = vector.multi_reduction <add>, %12, %cst_9 [1] : vector<16x64xf32> to vector<16xf32>
    %14 = vector.shape_cast %13 : vector<16xf32> to vector<16x1xf32>
    %cst_10 = arith.constant 1.562500e-02 : f32
    %15 = vector.broadcast %cst_10 : f32 to vector<16x1xf32>
    %16 = arith.mulf %14, %15 : vector<16x1xf32>
    %cst_11 = arith.constant 9.99999974E-6 : f32
    %17 = vector.broadcast %cst_11 : f32 to vector<16x1xf32>
    %18 = arith.addf %16, %17 : vector<16x1xf32>
    %19 = math.rsqrt %18 : vector<16x1xf32>
    %20 = arith.mulf %4, %19 : vector<16x1xf32>
    %21 = vector.broadcast %20 : vector<16x1xf32> to vector<16x64xf32>
    %22 = arith.mulf %11, %21 : vector<16x64xf32>
    %23 = vector.broadcast %5 : vector<16x1xf32> to vector<16x64xf32>
    %24 = arith.addf %22, %23 : vector<16x64xf32>
    %cst_12 = arith.constant 0.000000e+00 : f32
    %25 = vector.broadcast %cst_12 : f32 to vector<16x64xf32>
    %26 = arith.maximumf %24, %25 : vector<16x64xf32>
    %c0_13 = arith.constant 0 : index
    %c0_14 = arith.constant 0 : index
    %27 = vector.load %arg4[%c0_13, %c0_14] : memref<16x64xf32, #tpu.memory_space<vmem>>, vector<16x64xf32>
    tpu.vector_store %arg4[%c0_13, %c0_14], %26 {strides = array<i32>} : memref<16x64xf32, #tpu.memory_space<vmem>>, vector<16x64xf32>,
    return
  }
}

module attributes {stable_mosaic.version = 11 : i64} {
  func.func @kernel(%arg0: memref<16x32xf32, #tpu.memory_space<vmem>>, %arg1: memref<1x32xf32, #tpu.memory_space<vmem>>, %arg2: memref<1x32xf32, #tpu.memory_space<vmem>>, %arg3: memref<16x1xf32, #tpu.memory_space<vmem>>, %arg4: memref<16x1xf32, #tpu.memory_space<vmem>>, %arg5: memref<8x16xbf16, #tpu.memory_space<vmem>>, %arg6: memref<8x1xf32, #tpu.memory_space<vmem>>, %arg7: memref<8x1xf32, #tpu.memory_space<vmem>>, %arg8: memref<4x24xbf16, #tpu.memory_space<vmem>>, %arg9: memref<20x1xf32, #tpu.memory_space<vmem>>, %arg10: memref<20x1xf32, #tpu.memory_space<vmem>>, %arg11: memref<8x20xbf16, #tpu.memory_space<vmem>>, %arg12: memref<8x1xf32, #tpu.memory_space<vmem>>, %arg13: memref<8x1xf32, #tpu.memory_space<vmem>>, %arg14: memref<4x24xbf16, #tpu.memory_space<vmem>>, %arg15: memref<24x1xf32, #tpu.memory_space<vmem>>, %arg16: memref<24x1xf32, #tpu.memory_space<vmem>>, %arg17: memref<12x24xbf16, #tpu.memory_space<vmem>>, %arg18: memref<12x32xf32, #tpu.memory_space<vmem>>, %arg19: memref<24x32xf32, #tpu.memory_space<vmem>>) attributes {dimension_semantics = [], scalar_prefetch = 0 : i64, scratch_operands = 1 : i64, tpu.core_type = #tpu.core_type<tc>} {
    %c0 = arith.constant 0 : index
    %c0_0 = arith.constant 0 : index
    %0 = vector.load %arg0[%c0, %c0_0] : memref<16x32xf32, #tpu.memory_space<vmem>>, vector<16x32xf32>
    %c0_1 = arith.constant 0 : index
    %c0_2 = arith.constant 0 : index
    %1 = vector.load %arg19[%c0_1, %c0_2] : memref<24x32xf32, #tpu.memory_space<vmem>>, vector<16x32xf32>
    tpu.vector_store %arg19[%c0_1, %c0_2], %0 {strides = array<i32>} : memref<24x32xf32, #tpu.memory_space<vmem>>, vector<16x32xf32>,
    %c0_3 = arith.constant 0 : index
    %c0_4 = arith.constant 0 : index
    %2 = vector.load %arg1[%c0_3, %c0_4] : memref<1x32xf32, #tpu.memory_space<vmem>>, vector<1x32xf32>
    %cst = arith.constant 5.000000e-01 : f32
    %3 = vector.broadcast %cst : f32 to vector<1x32xf32>
    %4 = arith.cmpf ogt, %2, %3 : vector<1x32xf32>
    %c0_5 = arith.constant 0 : index
    %c0_6 = arith.constant 0 : index
    %5 = vector.load %arg2[%c0_5, %c0_6] : memref<1x32xf32, #tpu.memory_space<vmem>>, vector<1x32xf32>
    %cst_7 = arith.constant 5.000000e-01 : f32
    %6 = vector.broadcast %cst_7 : f32 to vector<1x32xf32>
    %7 = arith.cmpf ogt, %5, %6 : vector<1x32xf32>
    %c0_8 = arith.constant 0 : index
    %c0_9 = arith.constant 0 : index
    %8 = vector.load %arg19[%c0_8, %c0_9] : memref<24x32xf32, #tpu.memory_space<vmem>>, vector<16x32xf32>
    %c0_10 = arith.constant 0 : index
    %c0_11 = arith.constant 0 : index
    %9 = vector.load %arg3[%c0_10, %c0_11] : memref<16x1xf32, #tpu.memory_space<vmem>>, vector<16x1xf32>
    %c0_12 = arith.constant 0 : index
    %c0_13 = arith.constant 0 : index
    %10 = vector.load %arg4[%c0_12, %c0_13] : memref<16x1xf32, #tpu.memory_space<vmem>>, vector<16x1xf32>
    %cst_14 = arith.constant dense<0.000000e+00> : vector<16xf32>
    %11 = vector.multi_reduction <add>, %8, %cst_14 [1] : vector<16x32xf32> to vector<16xf32>
    %12 = vector.shape_cast %11 : vector<16xf32> to vector<16x1xf32>
    %cst_15 = arith.constant 3.125000e-02 : f32
    %13 = vector.broadcast %cst_15 : f32 to vector<16x1xf32>
    %14 = arith.mulf %12, %13 : vector<16x1xf32>
    %15 = vector.broadcast %14 : vector<16x1xf32> to vector<16x32xf32>
    %16 = arith.subf %8, %15 : vector<16x32xf32>
    %17 = arith.mulf %16, %16 : vector<16x32xf32>
    %cst_16 = arith.constant dense<0.000000e+00> : vector<16xf32>
    %18 = vector.multi_reduction <add>, %17, %cst_16 [1] : vector<16x32xf32> to vector<16xf32>
    %19 = vector.shape_cast %18 : vector<16xf32> to vector<16x1xf32>
    %cst_17 = arith.constant 3.125000e-02 : f32
    %20 = vector.broadcast %cst_17 : f32 to vector<16x1xf32>
    %21 = arith.mulf %19, %20 : vector<16x1xf32>
    %cst_18 = arith.constant 9.99999974E-6 : f32
    %22 = vector.broadcast %cst_18 : f32 to vector<16x1xf32>
    %23 = arith.addf %21, %22 : vector<16x1xf32>
    %24 = math.rsqrt %23 : vector<16x1xf32>
    %25 = arith.mulf %9, %24 : vector<16x1xf32>
    %26 = vector.broadcast %25 : vector<16x1xf32> to vector<16x32xf32>
    %27 = arith.mulf %16, %26 : vector<16x32xf32>
    %28 = vector.broadcast %10 : vector<16x1xf32> to vector<16x32xf32>
    %29 = arith.addf %27, %28 : vector<16x32xf32>
    %cst_19 = arith.constant 0.000000e+00 : f32
    %30 = vector.broadcast %cst_19 : f32 to vector<16x32xf32>
    %31 = arith.maximumf %29, %30 : vector<16x32xf32>
    %c0_20 = arith.constant 0 : index
    %c0_21 = arith.constant 0 : index
    %32 = vector.load %arg5[%c0_20, %c0_21] : memref<8x16xbf16, #tpu.memory_space<vmem>>, vector<8x16xbf16>
    %33 = arith.truncf %31 : vector<16x32xf32> to vector<16x32xbf16>
    %cst_22 = arith.constant dense<0.000000e+00> : vector<8x32xf32>
    %34 = tpu.matmul %32, %33, %cst_22 {dimension_numbers = #tpu.dot_dimension_numbers<[1], [0], [0], [1], [0, 0, 1, 1], [], []>} : vector<8x16xbf16>, vector<16x32xbf16>, vector<8x32xf32> -> vector<8x32xf32>
    %c0_23 = arith.constant 0 : index
    %c0_24 = arith.constant 0 : index
    %35 = vector.load %arg6[%c0_23, %c0_24] : memref<8x1xf32, #tpu.memory_space<vmem>>, vector<8x1xf32>
    %c0_25 = arith.constant 0 : index
    %c0_26 = arith.constant 0 : index
    %36 = vector.load %arg7[%c0_25, %c0_26] : memref<8x1xf32, #tpu.memory_space<vmem>>, vector<8x1xf32>
    %cst_27 = arith.constant dense<0.000000e+00> : vector<8xf32>
    %37 = vector.multi_reduction <add>, %34, %cst_27 [1] : vector<8x32xf32> to vector<8xf32>
    %38 = vector.shape_cast %37 : vector<8xf32> to vector<8x1xf32>
    %cst_28 = arith.constant 3.125000e-02 : f32
    %39 = vector.broadcast %cst_28 : f32 to vector<8x1xf32>
    %40 = arith.mulf %38, %39 : vector<8x1xf32>
    %41 = vector.broadcast %40 : vector<8x1xf32> to vector<8x32xf32>
    %42 = arith.subf %34, %41 : vector<8x32xf32>
    %43 = arith.mulf %42, %42 : vector<8x32xf32>
    %cst_29 = arith.constant dense<0.000000e+00> : vector<8xf32>
    %44 = vector.multi_reduction <add>, %43, %cst_29 [1] : vector<8x32xf32> to vector<8xf32>
    %45 = vector.shape_cast %44 : vector<8xf32> to vector<8x1xf32>
    %cst_30 = arith.constant 3.125000e-02 : f32
    %46 = vector.broadcast %cst_30 : f32 to vector<8x1xf32>
    %47 = arith.mulf %45, %46 : vector<8x1xf32>
    %cst_31 = arith.constant 9.99999974E-6 : f32
    %48 = vector.broadcast %cst_31 : f32 to vector<8x1xf32>
    %49 = arith.addf %47, %48 : vector<8x1xf32>
    %50 = math.rsqrt %49 : vector<8x1xf32>
    %51 = arith.mulf %35, %50 : vector<8x1xf32>
    %52 = vector.broadcast %51 : vector<8x1xf32> to vector<8x32xf32>
    %53 = arith.mulf %42, %52 : vector<8x32xf32>
    %54 = vector.broadcast %36 : vector<8x1xf32> to vector<8x32xf32>
    %55 = arith.addf %53, %54 : vector<8x32xf32>
    %cst_32 = arith.constant 0.000000e+00 : f32
    %56 = vector.broadcast %cst_32 : f32 to vector<8x32xf32>
    %57 = arith.maximumf %55, %56 : vector<8x32xf32>
    %c1_i32 = arith.constant 1 : i32
    %58 = tpu.dynamic_rotate %57 by %c1_i32 dim 1 : vector<8x32xf32>, i32 -> vector<8x32xf32>
    %cst_33 = arith.constant 0.000000e+00 : f32
    %59 = vector.shape_cast %4 : vector<1x32xi1> to vector<1x32xi1>
    %60 = vector.broadcast %59 : vector<1x32xi1> to vector<8x32xi1>
    %61 = vector.broadcast %cst_33 : f32 to vector<8x32xf32>
    %62 = arith.select %60, %58, %61 : vector<8x32xi1>, vector<8x32xf32>
    %c31_i32 = arith.constant 31 : i32
    %63 = tpu.dynamic_rotate %57 by %c31_i32 dim 1 : vector<8x32xf32>, i32 -> vector<8x32xf32>
    %cst_34 = arith.constant 0.000000e+00 : f32
    %64 = vector.shape_cast %7 : vector<1x32xi1> to vector<1x32xi1>
    %65 = vector.broadcast %64 : vector<1x32xi1> to vector<8x32xi1>
    %66 = vector.broadcast %cst_34 : f32 to vector<8x32xf32>
    %67 = arith.select %65, %63, %66 : vector<8x32xi1>, vector<8x32xf32>
    %68 = tpu.concatenate %62, %57, %67 in 0 : vector<8x32xf32>, vector<8x32xf32>, vector<8x32xf32> -> vector<24x32xf32>
    %c0_35 = arith.constant 0 : index
    %c0_36 = arith.constant 0 : index
    %69 = vector.load %arg8[%c0_35, %c0_36] : memref<4x24xbf16, #tpu.memory_space<vmem>>, vector<4x24xbf16>
    %70 = arith.truncf %68 : vector<24x32xf32> to vector<24x32xbf16>
    %cst_37 = arith.constant dense<0.000000e+00> : vector<4x32xf32>
    %71 = tpu.matmul %69, %70, %cst_37 {dimension_numbers = #tpu.dot_dimension_numbers<[1], [0], [0], [1], [0, 0, 1, 1], [], []>} : vector<4x24xbf16>, vector<24x32xbf16>, vector<4x32xf32> -> vector<4x32xf32>
    %c16 = arith.constant 16 : index
    %c0_38 = arith.constant 0 : index
    %72 = vector.load %arg19[%c16, %c0_38] : memref<24x32xf32, #tpu.memory_space<vmem>>, vector<4x32xf32>
    tpu.vector_store %arg19[%c16, %c0_38], %71 {strides = array<i32>} : memref<24x32xf32, #tpu.memory_space<vmem>>, vector<4x32xf32>,
    %c0_39 = arith.constant 0 : index
    %c0_40 = arith.constant 0 : index
    %73 = vector.load %arg19[%c0_39, %c0_40] : memref<24x32xf32, #tpu.memory_space<vmem>>, vector<20x32xf32>
    %c0_41 = arith.constant 0 : index
    %c0_42 = arith.constant 0 : index
    %74 = vector.load %arg9[%c0_41, %c0_42] : memref<20x1xf32, #tpu.memory_space<vmem>>, vector<20x1xf32>
    %c0_43 = arith.constant 0 : index
    %c0_44 = arith.constant 0 : index
    %75 = vector.load %arg10[%c0_43, %c0_44] : memref<20x1xf32, #tpu.memory_space<vmem>>, vector<20x1xf32>
    %cst_45 = arith.constant dense<0.000000e+00> : vector<20xf32>
    %76 = vector.multi_reduction <add>, %73, %cst_45 [1] : vector<20x32xf32> to vector<20xf32>
    %77 = vector.shape_cast %76 : vector<20xf32> to vector<20x1xf32>
    %cst_46 = arith.constant 3.125000e-02 : f32
    %78 = vector.broadcast %cst_46 : f32 to vector<20x1xf32>
    %79 = arith.mulf %77, %78 : vector<20x1xf32>
    %80 = vector.broadcast %79 : vector<20x1xf32> to vector<20x32xf32>
    %81 = arith.subf %73, %80 : vector<20x32xf32>
    %82 = arith.mulf %81, %81 : vector<20x32xf32>
    %cst_47 = arith.constant dense<0.000000e+00> : vector<20xf32>
    %83 = vector.multi_reduction <add>, %82, %cst_47 [1] : vector<20x32xf32> to vector<20xf32>
    %84 = vector.shape_cast %83 : vector<20xf32> to vector<20x1xf32>
    %cst_48 = arith.constant 3.125000e-02 : f32
    %85 = vector.broadcast %cst_48 : f32 to vector<20x1xf32>
    %86 = arith.mulf %84, %85 : vector<20x1xf32>
    %cst_49 = arith.constant 9.99999974E-6 : f32
    %87 = vector.broadcast %cst_49 : f32 to vector<20x1xf32>
    %88 = arith.addf %86, %87 : vector<20x1xf32>
    %89 = math.rsqrt %88 : vector<20x1xf32>
    %90 = arith.mulf %74, %89 : vector<20x1xf32>
    %91 = vector.broadcast %90 : vector<20x1xf32> to vector<20x32xf32>
    %92 = arith.mulf %81, %91 : vector<20x32xf32>
    %93 = vector.broadcast %75 : vector<20x1xf32> to vector<20x32xf32>
    %94 = arith.addf %92, %93 : vector<20x32xf32>
    %cst_50 = arith.constant 0.000000e+00 : f32
    %95 = vector.broadcast %cst_50 : f32 to vector<20x32xf32>
    %96 = arith.maximumf %94, %95 : vector<20x32xf32>
    %c0_51 = arith.constant 0 : index
    %c0_52 = arith.constant 0 : index
    %97 = vector.load %arg11[%c0_51, %c0_52] : memref<8x20xbf16, #tpu.memory_space<vmem>>, vector<8x20xbf16>
    %98 = arith.truncf %96 : vector<20x32xf32> to vector<20x32xbf16>
    %cst_53 = arith.constant dense<0.000000e+00> : vector<8x32xf32>
    %99 = tpu.matmul %97, %98, %cst_53 {dimension_numbers = #tpu.dot_dimension_numbers<[1], [0], [0], [1], [0, 0, 1, 1], [], []>} : vector<8x20xbf16>, vector<20x32xbf16>, vector<8x32xf32> -> vector<8x32xf32>
    %c0_54 = arith.constant 0 : index
    %c0_55 = arith.constant 0 : index
    %100 = vector.load %arg12[%c0_54, %c0_55] : memref<8x1xf32, #tpu.memory_space<vmem>>, vector<8x1xf32>
    %c0_56 = arith.constant 0 : index
    %c0_57 = arith.constant 0 : index
    %101 = vector.load %arg13[%c0_56, %c0_57] : memref<8x1xf32, #tpu.memory_space<vmem>>, vector<8x1xf32>
    %cst_58 = arith.constant dense<0.000000e+00> : vector<8xf32>
    %102 = vector.multi_reduction <add>, %99, %cst_58 [1] : vector<8x32xf32> to vector<8xf32>
    %103 = vector.shape_cast %102 : vector<8xf32> to vector<8x1xf32>
    %cst_59 = arith.constant 3.125000e-02 : f32
    %104 = vector.broadcast %cst_59 : f32 to vector<8x1xf32>
    %105 = arith.mulf %103, %104 : vector<8x1xf32>
    %106 = vector.broadcast %105 : vector<8x1xf32> to vector<8x32xf32>
    %107 = arith.subf %99, %106 : vector<8x32xf32>
    %108 = arith.mulf %107, %107 : vector<8x32xf32>
    %cst_60 = arith.constant dense<0.000000e+00> : vector<8xf32>
    %109 = vector.multi_reduction <add>, %108, %cst_60 [1] : vector<8x32xf32> to vector<8xf32>
    %110 = vector.shape_cast %109 : vector<8xf32> to vector<8x1xf32>
    %cst_61 = arith.constant 3.125000e-02 : f32
    %111 = vector.broadcast %cst_61 : f32 to vector<8x1xf32>
    %112 = arith.mulf %110, %111 : vector<8x1xf32>
    %cst_62 = arith.constant 9.99999974E-6 : f32
    %113 = vector.broadcast %cst_62 : f32 to vector<8x1xf32>
    %114 = arith.addf %112, %113 : vector<8x1xf32>
    %115 = math.rsqrt %114 : vector<8x1xf32>
    %116 = arith.mulf %100, %115 : vector<8x1xf32>
    %117 = vector.broadcast %116 : vector<8x1xf32> to vector<8x32xf32>
    %118 = arith.mulf %107, %117 : vector<8x32xf32>
    %119 = vector.broadcast %101 : vector<8x1xf32> to vector<8x32xf32>
    %120 = arith.addf %118, %119 : vector<8x32xf32>
    %cst_63 = arith.constant 0.000000e+00 : f32
    %121 = vector.broadcast %cst_63 : f32 to vector<8x32xf32>
    %122 = arith.maximumf %120, %121 : vector<8x32xf32>
    %c1_i32_64 = arith.constant 1 : i32
    %123 = tpu.dynamic_rotate %122 by %c1_i32_64 dim 1 : vector<8x32xf32>, i32 -> vector<8x32xf32>
    %cst_65 = arith.constant 0.000000e+00 : f32
    %124 = vector.shape_cast %4 : vector<1x32xi1> to vector<1x32xi1>
    %125 = vector.broadcast %124 : vector<1x32xi1> to vector<8x32xi1>
    %126 = vector.broadcast %cst_65 : f32 to vector<8x32xf32>
    %127 = arith.select %125, %123, %126 : vector<8x32xi1>, vector<8x32xf32>
    %c31_i32_66 = arith.constant 31 : i32
    %128 = tpu.dynamic_rotate %122 by %c31_i32_66 dim 1 : vector<8x32xf32>, i32 -> vector<8x32xf32>
    %cst_67 = arith.constant 0.000000e+00 : f32
    %129 = vector.shape_cast %7 : vector<1x32xi1> to vector<1x32xi1>
    %130 = vector.broadcast %129 : vector<1x32xi1> to vector<8x32xi1>
    %131 = vector.broadcast %cst_67 : f32 to vector<8x32xf32>
    %132 = arith.select %130, %128, %131 : vector<8x32xi1>, vector<8x32xf32>
    %133 = tpu.concatenate %127, %122, %132 in 0 : vector<8x32xf32>, vector<8x32xf32>, vector<8x32xf32> -> vector<24x32xf32>
    %c0_68 = arith.constant 0 : index
    %c0_69 = arith.constant 0 : index
    %134 = vector.load %arg14[%c0_68, %c0_69] : memref<4x24xbf16, #tpu.memory_space<vmem>>, vector<4x24xbf16>
    %135 = arith.truncf %133 : vector<24x32xf32> to vector<24x32xbf16>
    %cst_70 = arith.constant dense<0.000000e+00> : vector<4x32xf32>
    %136 = tpu.matmul %134, %135, %cst_70 {dimension_numbers = #tpu.dot_dimension_numbers<[1], [0], [0], [1], [0, 0, 1, 1], [], []>} : vector<4x24xbf16>, vector<24x32xbf16>, vector<4x32xf32> -> vector<4x32xf32>
    %c20 = arith.constant 20 : index
    %c0_71 = arith.constant 0 : index
    %137 = vector.load %arg19[%c20, %c0_71] : memref<24x32xf32, #tpu.memory_space<vmem>>, vector<4x32xf32>
    tpu.vector_store %arg19[%c20, %c0_71], %136 {strides = array<i32>} : memref<24x32xf32, #tpu.memory_space<vmem>>, vector<4x32xf32>,
    %c0_72 = arith.constant 0 : index
    %c0_73 = arith.constant 0 : index
    %138 = vector.load %arg19[%c0_72, %c0_73] : memref<24x32xf32, #tpu.memory_space<vmem>>, vector<24x32xf32>
    %c0_74 = arith.constant 0 : index
    %c0_75 = arith.constant 0 : index
    %139 = vector.load %arg15[%c0_74, %c0_75] : memref<24x1xf32, #tpu.memory_space<vmem>>, vector<24x1xf32>
    %c0_76 = arith.constant 0 : index
    %c0_77 = arith.constant 0 : index
    %140 = vector.load %arg16[%c0_76, %c0_77] : memref<24x1xf32, #tpu.memory_space<vmem>>, vector<24x1xf32>
    %cst_78 = arith.constant dense<0.000000e+00> : vector<24xf32>
    %141 = vector.multi_reduction <add>, %138, %cst_78 [1] : vector<24x32xf32> to vector<24xf32>
    %142 = vector.shape_cast %141 : vector<24xf32> to vector<24x1xf32>
    %cst_79 = arith.constant 3.125000e-02 : f32
    %143 = vector.broadcast %cst_79 : f32 to vector<24x1xf32>
    %144 = arith.mulf %142, %143 : vector<24x1xf32>
    %145 = vector.broadcast %144 : vector<24x1xf32> to vector<24x32xf32>
    %146 = arith.subf %138, %145 : vector<24x32xf32>
    %147 = arith.mulf %146, %146 : vector<24x32xf32>
    %cst_80 = arith.constant dense<0.000000e+00> : vector<24xf32>
    %148 = vector.multi_reduction <add>, %147, %cst_80 [1] : vector<24x32xf32> to vector<24xf32>
    %149 = vector.shape_cast %148 : vector<24xf32> to vector<24x1xf32>
    %cst_81 = arith.constant 3.125000e-02 : f32
    %150 = vector.broadcast %cst_81 : f32 to vector<24x1xf32>
    %151 = arith.mulf %149, %150 : vector<24x1xf32>
    %cst_82 = arith.constant 9.99999974E-6 : f32
    %152 = vector.broadcast %cst_82 : f32 to vector<24x1xf32>
    %153 = arith.addf %151, %152 : vector<24x1xf32>
    %154 = math.rsqrt %153 : vector<24x1xf32>
    %155 = arith.mulf %139, %154 : vector<24x1xf32>
    %156 = vector.broadcast %155 : vector<24x1xf32> to vector<24x32xf32>
    %157 = arith.mulf %146, %156 : vector<24x32xf32>
    %158 = vector.broadcast %140 : vector<24x1xf32> to vector<24x32xf32>
    %159 = arith.addf %157, %158 : vector<24x32xf32>
    %cst_83 = arith.constant 0.000000e+00 : f32
    %160 = vector.broadcast %cst_83 : f32 to vector<24x32xf32>
    %161 = arith.maximumf %159, %160 : vector<24x32xf32>
    %c0_84 = arith.constant 0 : index
    %c0_85 = arith.constant 0 : index
    %162 = vector.load %arg17[%c0_84, %c0_85] : memref<12x24xbf16, #tpu.memory_space<vmem>>, vector<12x24xbf16>
    %163 = arith.truncf %161 : vector<24x32xf32> to vector<24x32xbf16>
    %cst_86 = arith.constant dense<0.000000e+00> : vector<12x32xf32>
    %164 = tpu.matmul %162, %163, %cst_86 {dimension_numbers = #tpu.dot_dimension_numbers<[1], [0], [0], [1], [0, 0, 1, 1], [], []>} : vector<12x24xbf16>, vector<24x32xbf16>, vector<12x32xf32> -> vector<12x32xf32>
    %c0_87 = arith.constant 0 : index
    %c0_88 = arith.constant 0 : index
    %165 = vector.load %arg18[%c0_87, %c0_88] : memref<12x32xf32, #tpu.memory_space<vmem>>, vector<12x32xf32>
    tpu.vector_store %arg18[%c0_87, %c0_88], %164 {strides = array<i32>} : memref<12x32xf32, #tpu.memory_space<vmem>>, vector<12x32xf32>,
    return
  }
}

module attributes {stable_mosaic.version = 11 : i64} {
  func.func @kernel(%arg0: memref<12x16xf32, #tpu.memory_space<vmem>>, %arg1: memref<1x16xf32, #tpu.memory_space<vmem>>, %arg2: memref<1x16xf32, #tpu.memory_space<vmem>>, %arg3: memref<12x1xf32, #tpu.memory_space<vmem>>, %arg4: memref<12x1xf32, #tpu.memory_space<vmem>>, %arg5: memref<8x12xbf16, #tpu.memory_space<vmem>>, %arg6: memref<8x1xf32, #tpu.memory_space<vmem>>, %arg7: memref<8x1xf32, #tpu.memory_space<vmem>>, %arg8: memref<4x24xbf16, #tpu.memory_space<vmem>>, %arg9: memref<16x1xf32, #tpu.memory_space<vmem>>, %arg10: memref<16x1xf32, #tpu.memory_space<vmem>>, %arg11: memref<8x16xbf16, #tpu.memory_space<vmem>>, %arg12: memref<8x1xf32, #tpu.memory_space<vmem>>, %arg13: memref<8x1xf32, #tpu.memory_space<vmem>>, %arg14: memref<4x24xbf16, #tpu.memory_space<vmem>>, %arg15: memref<20x16xf32, #tpu.memory_space<vmem>>) attributes {dimension_semantics = [], scalar_prefetch = 0 : i64, scratch_operands = 0 : i64, tpu.core_type = #tpu.core_type<tc>} {
    %c0 = arith.constant 0 : index
    %c0_0 = arith.constant 0 : index
    %0 = vector.load %arg0[%c0, %c0_0] : memref<12x16xf32, #tpu.memory_space<vmem>>, vector<12x16xf32>
    %c0_1 = arith.constant 0 : index
    %c0_2 = arith.constant 0 : index
    %1 = vector.load %arg15[%c0_1, %c0_2] : memref<20x16xf32, #tpu.memory_space<vmem>>, vector<12x16xf32>
    tpu.vector_store %arg15[%c0_1, %c0_2], %0 {strides = array<i32>} : memref<20x16xf32, #tpu.memory_space<vmem>>, vector<12x16xf32>,
    %c0_3 = arith.constant 0 : index
    %c0_4 = arith.constant 0 : index
    %2 = vector.load %arg1[%c0_3, %c0_4] : memref<1x16xf32, #tpu.memory_space<vmem>>, vector<1x16xf32>
    %cst = arith.constant 5.000000e-01 : f32
    %3 = vector.broadcast %cst : f32 to vector<1x16xf32>
    %4 = arith.cmpf ogt, %2, %3 : vector<1x16xf32>
    %c0_5 = arith.constant 0 : index
    %c0_6 = arith.constant 0 : index
    %5 = vector.load %arg2[%c0_5, %c0_6] : memref<1x16xf32, #tpu.memory_space<vmem>>, vector<1x16xf32>
    %cst_7 = arith.constant 5.000000e-01 : f32
    %6 = vector.broadcast %cst_7 : f32 to vector<1x16xf32>
    %7 = arith.cmpf ogt, %5, %6 : vector<1x16xf32>
    %c0_8 = arith.constant 0 : index
    %c0_9 = arith.constant 0 : index
    %8 = vector.load %arg15[%c0_8, %c0_9] : memref<20x16xf32, #tpu.memory_space<vmem>>, vector<12x16xf32>
    %c0_10 = arith.constant 0 : index
    %c0_11 = arith.constant 0 : index
    %9 = vector.load %arg3[%c0_10, %c0_11] : memref<12x1xf32, #tpu.memory_space<vmem>>, vector<12x1xf32>
    %c0_12 = arith.constant 0 : index
    %c0_13 = arith.constant 0 : index
    %10 = vector.load %arg4[%c0_12, %c0_13] : memref<12x1xf32, #tpu.memory_space<vmem>>, vector<12x1xf32>
    %cst_14 = arith.constant dense<0.000000e+00> : vector<12xf32>
    %11 = vector.multi_reduction <add>, %8, %cst_14 [1] : vector<12x16xf32> to vector<12xf32>
    %12 = vector.shape_cast %11 : vector<12xf32> to vector<12x1xf32>
    %cst_15 = arith.constant 6.250000e-02 : f32
    %13 = vector.broadcast %cst_15 : f32 to vector<12x1xf32>
    %14 = arith.mulf %12, %13 : vector<12x1xf32>
    %15 = vector.broadcast %14 : vector<12x1xf32> to vector<12x16xf32>
    %16 = arith.subf %8, %15 : vector<12x16xf32>
    %17 = arith.mulf %16, %16 : vector<12x16xf32>
    %cst_16 = arith.constant dense<0.000000e+00> : vector<12xf32>
    %18 = vector.multi_reduction <add>, %17, %cst_16 [1] : vector<12x16xf32> to vector<12xf32>
    %19 = vector.shape_cast %18 : vector<12xf32> to vector<12x1xf32>
    %cst_17 = arith.constant 6.250000e-02 : f32
    %20 = vector.broadcast %cst_17 : f32 to vector<12x1xf32>
    %21 = arith.mulf %19, %20 : vector<12x1xf32>
    %cst_18 = arith.constant 9.99999974E-6 : f32
    %22 = vector.broadcast %cst_18 : f32 to vector<12x1xf32>
    %23 = arith.addf %21, %22 : vector<12x1xf32>
    %24 = math.rsqrt %23 : vector<12x1xf32>
    %25 = arith.mulf %9, %24 : vector<12x1xf32>
    %26 = vector.broadcast %25 : vector<12x1xf32> to vector<12x16xf32>
    %27 = arith.mulf %16, %26 : vector<12x16xf32>
    %28 = vector.broadcast %10 : vector<12x1xf32> to vector<12x16xf32>
    %29 = arith.addf %27, %28 : vector<12x16xf32>
    %cst_19 = arith.constant 0.000000e+00 : f32
    %30 = vector.broadcast %cst_19 : f32 to vector<12x16xf32>
    %31 = arith.maximumf %29, %30 : vector<12x16xf32>
    %c0_20 = arith.constant 0 : index
    %c0_21 = arith.constant 0 : index
    %32 = vector.load %arg5[%c0_20, %c0_21] : memref<8x12xbf16, #tpu.memory_space<vmem>>, vector<8x12xbf16>
    %33 = arith.truncf %31 : vector<12x16xf32> to vector<12x16xbf16>
    %cst_22 = arith.constant dense<0.000000e+00> : vector<8x16xf32>
    %34 = tpu.matmul %32, %33, %cst_22 {dimension_numbers = #tpu.dot_dimension_numbers<[1], [0], [0], [1], [0, 0, 1, 1], [], []>} : vector<8x12xbf16>, vector<12x16xbf16>, vector<8x16xf32> -> vector<8x16xf32>
    %c0_23 = arith.constant 0 : index
    %c0_24 = arith.constant 0 : index
    %35 = vector.load %arg6[%c0_23, %c0_24] : memref<8x1xf32, #tpu.memory_space<vmem>>, vector<8x1xf32>
    %c0_25 = arith.constant 0 : index
    %c0_26 = arith.constant 0 : index
    %36 = vector.load %arg7[%c0_25, %c0_26] : memref<8x1xf32, #tpu.memory_space<vmem>>, vector<8x1xf32>
    %cst_27 = arith.constant dense<0.000000e+00> : vector<8xf32>
    %37 = vector.multi_reduction <add>, %34, %cst_27 [1] : vector<8x16xf32> to vector<8xf32>
    %38 = vector.shape_cast %37 : vector<8xf32> to vector<8x1xf32>
    %cst_28 = arith.constant 6.250000e-02 : f32
    %39 = vector.broadcast %cst_28 : f32 to vector<8x1xf32>
    %40 = arith.mulf %38, %39 : vector<8x1xf32>
    %41 = vector.broadcast %40 : vector<8x1xf32> to vector<8x16xf32>
    %42 = arith.subf %34, %41 : vector<8x16xf32>
    %43 = arith.mulf %42, %42 : vector<8x16xf32>
    %cst_29 = arith.constant dense<0.000000e+00> : vector<8xf32>
    %44 = vector.multi_reduction <add>, %43, %cst_29 [1] : vector<8x16xf32> to vector<8xf32>
    %45 = vector.shape_cast %44 : vector<8xf32> to vector<8x1xf32>
    %cst_30 = arith.constant 6.250000e-02 : f32
    %46 = vector.broadcast %cst_30 : f32 to vector<8x1xf32>
    %47 = arith.mulf %45, %46 : vector<8x1xf32>
    %cst_31 = arith.constant 9.99999974E-6 : f32
    %48 = vector.broadcast %cst_31 : f32 to vector<8x1xf32>
    %49 = arith.addf %47, %48 : vector<8x1xf32>
    %50 = math.rsqrt %49 : vector<8x1xf32>
    %51 = arith.mulf %35, %50 : vector<8x1xf32>
    %52 = vector.broadcast %51 : vector<8x1xf32> to vector<8x16xf32>
    %53 = arith.mulf %42, %52 : vector<8x16xf32>
    %54 = vector.broadcast %36 : vector<8x1xf32> to vector<8x16xf32>
    %55 = arith.addf %53, %54 : vector<8x16xf32>
    %cst_32 = arith.constant 0.000000e+00 : f32
    %56 = vector.broadcast %cst_32 : f32 to vector<8x16xf32>
    %57 = arith.maximumf %55, %56 : vector<8x16xf32>
    %c1_i32 = arith.constant 1 : i32
    %58 = tpu.dynamic_rotate %57 by %c1_i32 dim 1 : vector<8x16xf32>, i32 -> vector<8x16xf32>
    %cst_33 = arith.constant 0.000000e+00 : f32
    %59 = vector.shape_cast %4 : vector<1x16xi1> to vector<1x16xi1>
    %60 = vector.broadcast %59 : vector<1x16xi1> to vector<8x16xi1>
    %61 = vector.broadcast %cst_33 : f32 to vector<8x16xf32>
    %62 = arith.select %60, %58, %61 : vector<8x16xi1>, vector<8x16xf32>
    %c15_i32 = arith.constant 15 : i32
    %63 = tpu.dynamic_rotate %57 by %c15_i32 dim 1 : vector<8x16xf32>, i32 -> vector<8x16xf32>
    %cst_34 = arith.constant 0.000000e+00 : f32
    %64 = vector.shape_cast %7 : vector<1x16xi1> to vector<1x16xi1>
    %65 = vector.broadcast %64 : vector<1x16xi1> to vector<8x16xi1>
    %66 = vector.broadcast %cst_34 : f32 to vector<8x16xf32>
    %67 = arith.select %65, %63, %66 : vector<8x16xi1>, vector<8x16xf32>
    %68 = tpu.concatenate %62, %57, %67 in 0 : vector<8x16xf32>, vector<8x16xf32>, vector<8x16xf32> -> vector<24x16xf32>
    %c0_35 = arith.constant 0 : index
    %c0_36 = arith.constant 0 : index
    %69 = vector.load %arg8[%c0_35, %c0_36] : memref<4x24xbf16, #tpu.memory_space<vmem>>, vector<4x24xbf16>
    %70 = arith.truncf %68 : vector<24x16xf32> to vector<24x16xbf16>
    %cst_37 = arith.constant dense<0.000000e+00> : vector<4x16xf32>
    %71 = tpu.matmul %69, %70, %cst_37 {dimension_numbers = #tpu.dot_dimension_numbers<[1], [0], [0], [1], [0, 0, 1, 1], [], []>} : vector<4x24xbf16>, vector<24x16xbf16>, vector<4x16xf32> -> vector<4x16xf32>
    %c12 = arith.constant 12 : index
    %c0_38 = arith.constant 0 : index
    %72 = vector.load %arg15[%c12, %c0_38] : memref<20x16xf32, #tpu.memory_space<vmem>>, vector<4x16xf32>
    tpu.vector_store %arg15[%c12, %c0_38], %71 {strides = array<i32>} : memref<20x16xf32, #tpu.memory_space<vmem>>, vector<4x16xf32>,
    %c0_39 = arith.constant 0 : index
    %c0_40 = arith.constant 0 : index
    %73 = vector.load %arg15[%c0_39, %c0_40] : memref<20x16xf32, #tpu.memory_space<vmem>>, vector<16x16xf32>
    %c0_41 = arith.constant 0 : index
    %c0_42 = arith.constant 0 : index
    %74 = vector.load %arg9[%c0_41, %c0_42] : memref<16x1xf32, #tpu.memory_space<vmem>>, vector<16x1xf32>
    %c0_43 = arith.constant 0 : index
    %c0_44 = arith.constant 0 : index
    %75 = vector.load %arg10[%c0_43, %c0_44] : memref<16x1xf32, #tpu.memory_space<vmem>>, vector<16x1xf32>
    %cst_45 = arith.constant dense<0.000000e+00> : vector<16xf32>
    %76 = vector.multi_reduction <add>, %73, %cst_45 [1] : vector<16x16xf32> to vector<16xf32>
    %77 = vector.shape_cast %76 : vector<16xf32> to vector<16x1xf32>
    %cst_46 = arith.constant 6.250000e-02 : f32
    %78 = vector.broadcast %cst_46 : f32 to vector<16x1xf32>
    %79 = arith.mulf %77, %78 : vector<16x1xf32>
    %80 = vector.broadcast %79 : vector<16x1xf32> to vector<16x16xf32>
    %81 = arith.subf %73, %80 : vector<16x16xf32>
    %82 = arith.mulf %81, %81 : vector<16x16xf32>
    %cst_47 = arith.constant dense<0.000000e+00> : vector<16xf32>
    %83 = vector.multi_reduction <add>, %82, %cst_47 [1] : vector<16x16xf32> to vector<16xf32>
    %84 = vector.shape_cast %83 : vector<16xf32> to vector<16x1xf32>
    %cst_48 = arith.constant 6.250000e-02 : f32
    %85 = vector.broadcast %cst_48 : f32 to vector<16x1xf32>
    %86 = arith.mulf %84, %85 : vector<16x1xf32>
    %cst_49 = arith.constant 9.99999974E-6 : f32
    %87 = vector.broadcast %cst_49 : f32 to vector<16x1xf32>
    %88 = arith.addf %86, %87 : vector<16x1xf32>
    %89 = math.rsqrt %88 : vector<16x1xf32>
    %90 = arith.mulf %74, %89 : vector<16x1xf32>
    %91 = vector.broadcast %90 : vector<16x1xf32> to vector<16x16xf32>
    %92 = arith.mulf %81, %91 : vector<16x16xf32>
    %93 = vector.broadcast %75 : vector<16x1xf32> to vector<16x16xf32>
    %94 = arith.addf %92, %93 : vector<16x16xf32>
    %cst_50 = arith.constant 0.000000e+00 : f32
    %95 = vector.broadcast %cst_50 : f32 to vector<16x16xf32>
    %96 = arith.maximumf %94, %95 : vector<16x16xf32>
    %c0_51 = arith.constant 0 : index
    %c0_52 = arith.constant 0 : index
    %97 = vector.load %arg11[%c0_51, %c0_52] : memref<8x16xbf16, #tpu.memory_space<vmem>>, vector<8x16xbf16>
    %98 = arith.truncf %96 : vector<16x16xf32> to vector<16x16xbf16>
    %cst_53 = arith.constant dense<0.000000e+00> : vector<8x16xf32>
    %99 = tpu.matmul %97, %98, %cst_53 {dimension_numbers = #tpu.dot_dimension_numbers<[1], [0], [0], [1], [0, 0, 1, 1], [], []>} : vector<8x16xbf16>, vector<16x16xbf16>, vector<8x16xf32> -> vector<8x16xf32>
    %c0_54 = arith.constant 0 : index
    %c0_55 = arith.constant 0 : index
    %100 = vector.load %arg12[%c0_54, %c0_55] : memref<8x1xf32, #tpu.memory_space<vmem>>, vector<8x1xf32>
    %c0_56 = arith.constant 0 : index
    %c0_57 = arith.constant 0 : index
    %101 = vector.load %arg13[%c0_56, %c0_57] : memref<8x1xf32, #tpu.memory_space<vmem>>, vector<8x1xf32>
    %cst_58 = arith.constant dense<0.000000e+00> : vector<8xf32>
    %102 = vector.multi_reduction <add>, %99, %cst_58 [1] : vector<8x16xf32> to vector<8xf32>
    %103 = vector.shape_cast %102 : vector<8xf32> to vector<8x1xf32>
    %cst_59 = arith.constant 6.250000e-02 : f32
    %104 = vector.broadcast %cst_59 : f32 to vector<8x1xf32>
    %105 = arith.mulf %103, %104 : vector<8x1xf32>
    %106 = vector.broadcast %105 : vector<8x1xf32> to vector<8x16xf32>
    %107 = arith.subf %99, %106 : vector<8x16xf32>
    %108 = arith.mulf %107, %107 : vector<8x16xf32>
    %cst_60 = arith.constant dense<0.000000e+00> : vector<8xf32>
    %109 = vector.multi_reduction <add>, %108, %cst_60 [1] : vector<8x16xf32> to vector<8xf32>
    %110 = vector.shape_cast %109 : vector<8xf32> to vector<8x1xf32>
    %cst_61 = arith.constant 6.250000e-02 : f32
    %111 = vector.broadcast %cst_61 : f32 to vector<8x1xf32>
    %112 = arith.mulf %110, %111 : vector<8x1xf32>
    %cst_62 = arith.constant 9.99999974E-6 : f32
    %113 = vector.broadcast %cst_62 : f32 to vector<8x1xf32>
    %114 = arith.addf %112, %113 : vector<8x1xf32>
    %115 = math.rsqrt %114 : vector<8x1xf32>
    %116 = arith.mulf %100, %115 : vector<8x1xf32>
    %117 = vector.broadcast %116 : vector<8x1xf32> to vector<8x16xf32>
    %118 = arith.mulf %107, %117 : vector<8x16xf32>
    %119 = vector.broadcast %101 : vector<8x1xf32> to vector<8x16xf32>
    %120 = arith.addf %118, %119 : vector<8x16xf32>
    %cst_63 = arith.constant 0.000000e+00 : f32
    %121 = vector.broadcast %cst_63 : f32 to vector<8x16xf32>
    %122 = arith.maximumf %120, %121 : vector<8x16xf32>
    %c1_i32_64 = arith.constant 1 : i32
    %123 = tpu.dynamic_rotate %122 by %c1_i32_64 dim 1 : vector<8x16xf32>, i32 -> vector<8x16xf32>
    %cst_65 = arith.constant 0.000000e+00 : f32
    %124 = vector.shape_cast %4 : vector<1x16xi1> to vector<1x16xi1>
    %125 = vector.broadcast %124 : vector<1x16xi1> to vector<8x16xi1>
    %126 = vector.broadcast %cst_65 : f32 to vector<8x16xf32>
    %127 = arith.select %125, %123, %126 : vector<8x16xi1>, vector<8x16xf32>
    %c15_i32_66 = arith.constant 15 : i32
    %128 = tpu.dynamic_rotate %122 by %c15_i32_66 dim 1 : vector<8x16xf32>, i32 -> vector<8x16xf32>
    %cst_67 = arith.constant 0.000000e+00 : f32
    %129 = vector.shape_cast %7 : vector<1x16xi1> to vector<1x16xi1>
    %130 = vector.broadcast %129 : vector<1x16xi1> to vector<8x16xi1>
    %131 = vector.broadcast %cst_67 : f32 to vector<8x16xf32>
    %132 = arith.select %130, %128, %131 : vector<8x16xi1>, vector<8x16xf32>
    %133 = tpu.concatenate %127, %122, %132 in 0 : vector<8x16xf32>, vector<8x16xf32>, vector<8x16xf32> -> vector<24x16xf32>
    %c0_68 = arith.constant 0 : index
    %c0_69 = arith.constant 0 : index
    %134 = vector.load %arg14[%c0_68, %c0_69] : memref<4x24xbf16, #tpu.memory_space<vmem>>, vector<4x24xbf16>
    %135 = arith.truncf %133 : vector<24x16xf32> to vector<24x16xbf16>
    %cst_70 = arith.constant dense<0.000000e+00> : vector<4x16xf32>
    %136 = tpu.matmul %134, %135, %cst_70 {dimension_numbers = #tpu.dot_dimension_numbers<[1], [0], [0], [1], [0, 0, 1, 1], [], []>} : vector<4x24xbf16>, vector<24x16xbf16>, vector<4x16xf32> -> vector<4x16xf32>
    %c16 = arith.constant 16 : index
    %c0_71 = arith.constant 0 : index
    %137 = vector.load %arg15[%c16, %c0_71] : memref<20x16xf32, #tpu.memory_space<vmem>>, vector<4x16xf32>
    tpu.vector_store %arg15[%c16, %c0_71], %136 {strides = array<i32>} : memref<20x16xf32, #tpu.memory_space<vmem>>, vector<4x16xf32>,
    return
  }
}

module attributes {stable_mosaic.version = 11 : i64} {
  func.func @_bn_relu_kernel(%arg0: memref<20x16xf32, #tpu.memory_space<vmem>>, %arg1: memref<20x1xf32, #tpu.memory_space<vmem>>, %arg2: memref<20x1xf32, #tpu.memory_space<vmem>>, %arg3: memref<20x16xf32, #tpu.memory_space<vmem>>) attributes {dimension_semantics = [], scalar_prefetch = 0 : i64, scratch_operands = 0 : i64, tpu.core_type = #tpu.core_type<tc>} {
    %c0 = arith.constant 0 : index
    %c0_0 = arith.constant 0 : index
    %0 = vector.load %arg0[%c0, %c0_0] : memref<20x16xf32, #tpu.memory_space<vmem>>, vector<20x16xf32>
    %c0_1 = arith.constant 0 : index
    %c0_2 = arith.constant 0 : index
    %1 = vector.load %arg1[%c0_1, %c0_2] : memref<20x1xf32, #tpu.memory_space<vmem>>, vector<20x1xf32>
    %c0_3 = arith.constant 0 : index
    %c0_4 = arith.constant 0 : index
    %2 = vector.load %arg2[%c0_3, %c0_4] : memref<20x1xf32, #tpu.memory_space<vmem>>, vector<20x1xf32>
    %cst = arith.constant dense<0.000000e+00> : vector<20xf32>
    %3 = vector.multi_reduction <add>, %0, %cst [1] : vector<20x16xf32> to vector<20xf32>
    %4 = vector.shape_cast %3 : vector<20xf32> to vector<20x1xf32>
    %cst_5 = arith.constant 6.250000e-02 : f32
    %5 = vector.broadcast %cst_5 : f32 to vector<20x1xf32>
    %6 = arith.mulf %4, %5 : vector<20x1xf32>
    %7 = vector.broadcast %6 : vector<20x1xf32> to vector<20x16xf32>
    %8 = arith.subf %0, %7 : vector<20x16xf32>
    %9 = arith.mulf %8, %8 : vector<20x16xf32>
    %cst_6 = arith.constant dense<0.000000e+00> : vector<20xf32>
    %10 = vector.multi_reduction <add>, %9, %cst_6 [1] : vector<20x16xf32> to vector<20xf32>
    %11 = vector.shape_cast %10 : vector<20xf32> to vector<20x1xf32>
    %cst_7 = arith.constant 6.250000e-02 : f32
    %12 = vector.broadcast %cst_7 : f32 to vector<20x1xf32>
    %13 = arith.mulf %11, %12 : vector<20x1xf32>
    %cst_8 = arith.constant 9.99999974E-6 : f32
    %14 = vector.broadcast %cst_8 : f32 to vector<20x1xf32>
    %15 = arith.addf %13, %14 : vector<20x1xf32>
    %16 = math.rsqrt %15 : vector<20x1xf32>
    %17 = arith.mulf %1, %16 : vector<20x1xf32>
    %18 = vector.broadcast %17 : vector<20x1xf32> to vector<20x16xf32>
    %19 = arith.mulf %8, %18 : vector<20x16xf32>
    %20 = vector.broadcast %2 : vector<20x1xf32> to vector<20x16xf32>
    %21 = arith.addf %19, %20 : vector<20x16xf32>
    %cst_9 = arith.constant 0.000000e+00 : f32
    %22 = vector.broadcast %cst_9 : f32 to vector<20x16xf32>
    %23 = arith.maximumf %21, %22 : vector<20x16xf32>
    %c0_10 = arith.constant 0 : index
    %c0_11 = arith.constant 0 : index
    %24 = vector.load %arg3[%c0_10, %c0_11] : memref<20x16xf32, #tpu.memory_space<vmem>>, vector<20x16xf32>
    tpu.vector_store %arg3[%c0_10, %c0_11], %23 {strides = array<i32>} : memref<20x16xf32, #tpu.memory_space<vmem>>, vector<20x16xf32>,
    return
  }
}

module attributes {stable_mosaic.version = 11 : i64} {
  func.func @_linear_kernel(%arg0: memref<2x40xf32, #tpu.memory_space<vmem>>, %arg1: memref<40x16xbf16, #tpu.memory_space<vmem>>, %arg2: memref<1x16xf32, #tpu.memory_space<vmem>>, %arg3: memref<2x16xf32, #tpu.memory_space<vmem>>) attributes {dimension_semantics = [], scalar_prefetch = 0 : i64, scratch_operands = 0 : i64, tpu.core_type = #tpu.core_type<tc>} {
    %c0 = arith.constant 0 : index
    %c0_0 = arith.constant 0 : index
    %0 = vector.load %arg0[%c0, %c0_0] : memref<2x40xf32, #tpu.memory_space<vmem>>, vector<2x40xf32>
    %1 = arith.truncf %0 : vector<2x40xf32> to vector<2x40xbf16>
    %c0_1 = arith.constant 0 : index
    %c0_2 = arith.constant 0 : index
    %2 = vector.load %arg1[%c0_1, %c0_2] : memref<40x16xbf16, #tpu.memory_space<vmem>>, vector<40x16xbf16>
    %cst = arith.constant dense<0.000000e+00> : vector<2x16xf32>
    %3 = tpu.matmul %1, %2, %cst {dimension_numbers = #tpu.dot_dimension_numbers<[1], [0], [0], [1], [0, 0, 1, 1], [], []>} : vector<2x40xbf16>, vector<40x16xbf16>, vector<2x16xf32> -> vector<2x16xf32>
    %c0_3 = arith.constant 0 : index
    %c0_4 = arith.constant 0 : index
    %4 = vector.load %arg2[%c0_3, %c0_4] : memref<1x16xf32, #tpu.memory_space<vmem>>, vector<1x16xf32>
    %5 = vector.broadcast %4 : vector<1x16xf32> to vector<2x16xf32>
    %6 = arith.addf %3, %5 : vector<2x16xf32>
    %c0_5 = arith.constant 0 : index
    %c0_6 = arith.constant 0 : index
    %7 = vector.load %arg3[%c0_5, %c0_6] : memref<2x16xf32, #tpu.memory_space<vmem>>, vector<2x16xf32>
    tpu.vector_store %arg3[%c0_5, %c0_6], %6 {strides = array<i32>} : memref<2x16xf32, #tpu.memory_space<vmem>>, vector<2x16xf32>,
    return
  }
}

</mosaic_0001>

<bundles_post_ra>
// kernel: densenet_forward.5
= control target key start
LH: loop header
LB: loop body
LE: loop exit
PB: predicated region body
PF: predicated region fallthrough
CT: control target
= control target key end

     0   :  { %vm425_vm0 = vmmov 0   ;;  %vm154_vm1 = vcmask 392192   ;;  %vm285_vm2 = vcmask 523264   ;;  %s701_s0 = inlined_call_operand.vmem [shape: f32[560,64], index: 0, kind: input, shape index: {}]   ;;  %s702_s1 = inlined_call_operand.vmem [shape: bf16[16,560], index: 1, kind: input, shape index: {}]   ;;  %s703_s3 = inlined_call_operand.vmem [shape: f32[16,1], index: 3, kind: input, shape index: {}]   ;;  %s704_s2 = inlined_call_operand.vmem [shape: f32[16,1], index: 2, kind: input, shape index: {}]   ;;  %s705_s4 = inlined_call_operand.vmem [shape: f32[16,64], index: 4, kind: output, shape index: {}]  }
   0x1   :  { %v40_v0 = vld [vmem:[%s701_s0 + $0x80] sm:$0xff]  ;;  %v41_v1 = vld [vmem:[%s701_s0 + $0x88] sm:$0xff]  ;;  %v42_v11 = vld [vmem:[%s701_s0 + $0x90] sm:$0xff] }
   0x2   :  { %v72_v2 = vld [vmem:[%s701_s0 + $0x180] sm:$0xff]  ;;  %v102_v3 = vpack.c.bf16 %v41_v1, %v40_v0  ;;  %v73_v4 = vld [vmem:[%s701_s0 + $0x188] sm:$0xff]  ;;  %v43_v13 = vld [vmem:[%s701_s0 + $0x98] sm:$0xff] }
   0x3   :  { %v24_v5 = vld [vmem:[%s701_s0] sm:$0xff]  ;;  %v25_v6 = vld [vmem:[%s701_s0 + $0x8] sm:$0xff]  ;;  %v118_v7 = vpack.c.bf16 %v73_v4, %v72_v2  ;;  %v74_v14 = vld [vmem:[%s701_s0 + $0x190] sm:$0xff]  ;;  %v103_v16 = vpack.c.bf16 %v43_v13, %v42_v11 }
   0x4   :  { %v94_v8 = vpack.c.bf16 %v25_v6, %v24_v5  ;;  %v56_v9 = vld [vmem:[%s701_s0 + $0x100] sm:$0xff]  ;;  %v57_v10 = vld [vmem:[%s701_s0 + $0x108] sm:$0xff]  ;;  %350 = vmatprep.subr.bf16.mxu0 %v102_v3  ;;  %v75_v15 = vld [vmem:[%s701_s0 + $0x198] sm:$0xff] }
   0x5   :  { %v110_v12 = vpack.c.bf16 %v57_v10, %v56_v9  ;;  %372 = vmatprep.subr.bf16.mxu1 %v118_v7  ;;  %v119_v17 = vpack.c.bf16 %v75_v15, %v74_v14  ;;  %v26_v18 = vld [vmem:[%s701_s0 + $0x10] sm:$0xff]  ;;  %v27_v19 = vld [vmem:[%s701_s0 + $0x18] sm:$0xff]  ;;  %v44_v23 = vld [vmem:[%s701_s0 + $0xa0] sm:$0xff] }
   0x6   :  { %351 = vmatpush3.bf16.msra.mxu0 %v94_v8  ;;  %v58_v20 = vld [vmem:[%s701_s0 + $0x110] sm:$0xff]  ;;  %v95_v21 = vpack.c.bf16 %v27_v19, %v26_v18  ;;  %v59_v22 = vld [vmem:[%s701_s0 + $0x118] sm:$0xff]  ;;  %v45_v24 = vld [vmem:[%s701_s0 + $0xa8] sm:$0xff] }
   0x7   :  { %373 = vmatpush3.bf16.msra.mxu1 %v110_v12  ;;  %352 = vmatprep.subr.bf16.mxu0 %v103_v16  ;;  %v111_v25 = vpack.c.bf16 %v59_v22, %v58_v20  ;;  %v104_v26 = vpack.c.bf16 %v45_v24, %v44_v23  ;;  %v76_v27 = vld [vmem:[%s701_s0 + $0x1a0] sm:$0xff]  ;;  %v77_v28 = vld [vmem:[%s701_s0 + $0x1a8] sm:$0xff]  ;;  %v46_v35 = vld [vmem:[%s701_s0 + $0xb0] sm:$0xff] }
   0x8   :  { %374 = vmatprep.subr.bf16.mxu1 %v119_v17  ;;  %v28_v29 = vld [vmem:[%s701_s0 + $0x20] sm:$0xff]  ;;  %v120_v30 = vpack.c.bf16 %v77_v28, %v76_v27  ;;  %v29_v31 = vld [vmem:[%s701_s0 + $0x28] sm:$0xff]  ;;  %v47_v36 = vld [vmem:[%s701_s0 + $0xb8] sm:$0xff] }
   0x9   :  { %v60_v32 = vld [vmem:[%s701_s0 + $0x120] sm:$0xff]  ;;  %v61_v33 = vld [vmem:[%s701_s0 + $0x128] sm:$0xff]  ;;  %v96_v34 = vpack.c.bf16 %v29_v31, %v28_v29  ;;  %v78_v37 = vld [vmem:[%s701_s0 + $0x1b0] sm:$0xff]  ;;  %v105_v39 = vpack.c.bf16 %v47_v36, %v46_v35 }
   0xa   :  { %353 = vmatpush3.bf16.msra.mxu0 %v95_v21  ;;  %v112_v38 = vpack.c.bf16 %v61_v33, %v60_v32  ;;  %v79_v40 = vld [vmem:[%s701_s0 + $0x1b8] sm:$0xff]  ;;  %v30_v41 = vld [vmem:[%s701_s0 + $0x30] sm:$0xff]  ;;  %v48_v46 = vld [vmem:[%s701_s0 + $0xc0] sm:$0xff] }
   0xb   :  { %375 = vmatpush3.bf16.msra.mxu1 %v111_v25  ;;  %354 = vmatprep.subr.bf16.mxu0 %v104_v26  ;;  %v31_v42 = vld [vmem:[%s701_s0 + $0x38] sm:$0xff]  ;;  %v121_v43 = vpack.c.bf16 %v79_v40, %v78_v37  ;;  %v62_v44 = vld [vmem:[%s701_s0 + $0x130] sm:$0xff]  ;;  %v49_v47 = vld [vmem:[%s701_s0 + $0xc8] sm:$0xff] }
   0xc   :  { %376 = vmatprep.subr.bf16.mxu1 %v120_v30  ;;  %v63_v45 = vld [vmem:[%s701_s0 + $0x138] sm:$0xff]  ;;  %v80_v48 = vld [vmem:[%s701_s0 + $0x1c0] sm:$0xff]  ;;  %v81_v49 = vld [vmem:[%s701_s0 + $0x1c8] sm:$0xff]  ;;  %v97_v50 = vpack.c.bf16 %v31_v42, %v30_v41  ;;  %v106_v52 = vpack.c.bf16 %v49_v47, %v48_v46 }
   0xd   :  { %v113_v51 = vpack.c.bf16 %v63_v45, %v62_v44  ;;  %v32_v53 = vld [vmem:[%s701_s0 + $0x40] sm:$0xff]  ;;  %v33_v54 = vld [vmem:[%s701_s0 + $0x48] sm:$0xff]  ;;  %v122_v56 = vpack.c.bf16 %v81_v49, %v80_v48  ;;  %v50_v58 = vld [vmem:[%s701_s0 + $0xd0] sm:$0xff] }
   0xe   :  { %355 = vmatpush3.bf16.msra.mxu0 %v96_v34  ;;  %v64_v55 = vld [vmem:[%s701_s0 + $0x140] sm:$0xff]  ;;  %v65_v57 = vld [vmem:[%s701_s0 + $0x148] sm:$0xff]  ;;  %v51_v59 = vld [vmem:[%s701_s0 + $0xd8] sm:$0xff]  ;;  %v98_v62 = vpack.c.bf16 %v33_v54, %v32_v53 }
   0xf   :  { %377 = vmatpush3.bf16.msra.mxu1 %v112_v38  ;;  %356 = vmatprep.subr.bf16.mxu0 %v105_v39  ;;  %v82_v60 = vld [vmem:[%s701_s0 + $0x1d0] sm:$0xff]  ;;  %v83_v61 = vld [vmem:[%s701_s0 + $0x1d8] sm:$0xff]  ;;  %v114_v0 = vpack.c.bf16 %v65_v57, %v64_v55  ;;  %v107_v1 = vpack.c.bf16 %v51_v59, %v50_v58  ;;  %v52_v6 = vld [vmem:[%s701_s0 + $0xe0] sm:$0xff]  ;;  %v424_v39 = vmov 0.0  }
  0x10   :  { %378 = vmatprep.subr.bf16.mxu1 %v121_v43  ;;  %v34_v63 = vld [vmem:[%s701_s0 + $0x50] sm:$0xff]  ;;  %v35_v2 = vld [vmem:[%s701_s0 + $0x58] sm:$0xff]  ;;  %v123_v5 = vpack.c.bf16 %v83_v61, %v82_v60  ;;  %v53_v7 = vld [vmem:[%s701_s0 + $0xe8] sm:$0xff] }
  0x11   :  { %v66_v3 = vld [vmem:[%s701_s0 + $0x150] sm:$0xff]  ;;  %v67_v4 = vld [vmem:[%s701_s0 + $0x158] sm:$0xff]  ;;  %v84_v8 = vld [vmem:[%s701_s0 + $0x1e0] sm:$0xff]  ;;  %v99_v12 = vpack.c.bf16 %v35_v2, %v34_v63  ;;  %v108_v17 = vpack.c.bf16 %v53_v7, %v52_v6 }
  0x12   :  { %357 = vmatpush3.bf16.msra.mxu0 %v97_v50  ;;  %v85_v9 = vld [vmem:[%s701_s0 + $0x1e8] sm:$0xff]  ;;  %v36_v10 = vld [vmem:[%s701_s0 + $0x60] sm:$0xff]  ;;  %v54_v15 = vld [vmem:[%s701_s0 + $0xf0] sm:$0xff]  ;;  %v115_v16 = vpack.c.bf16 %v67_v4, %v66_v3 }
  0x13   :  { %379 = vmatpush3.bf16.msra.mxu1 %v113_v51  ;;  %358 = vmatprep.subr.bf16.mxu0 %v106_v52  ;;  %v37_v11 = vld [vmem:[%s701_s0 + $0x68] sm:$0xff]  ;;  %v68_v13 = vld [vmem:[%s701_s0 + $0x160] sm:$0xff]  ;;  %v55_v18 = vld [vmem:[%s701_s0 + $0xf8] sm:$0xff]  ;;  %v124_v19 = vpack.c.bf16 %v85_v9, %v84_v8 }
  0x14   :  { %380 = vmatprep.subr.bf16.mxu1 %v122_v56  ;;  %v69_v14 = vld [vmem:[%s701_s0 + $0x168] sm:$0xff]  ;;  %v86_v20 = vld [vmem:[%s701_s0 + $0x1f0] sm:$0xff]  ;;  %v415_v21 = vld [vmem:[%s702_s1 + $0x4] ss:$20 sps:$4 sm:$0xff]   ;;  %v100_v24 = vpack.c.bf16 %v37_v11, %v36_v10  ;;  %v109_v26 = vpack.c.bf16 %v55_v18, %v54_v15  ;;  %v426_v15 = vmov 0  }
  0x15   :  { %v87_v22 = vld [vmem:[%s701_s0 + $0x1f8] sm:$0xff]  ;;  %v418_v23 = vld [vmem:[%s702_s1 + $0xc] ss:$20 sps:$4 sm:$0xff]   ;;  %190 = vmatprep.mubr.bf16.mxu0 %v415_v21  ;;  %v116_v25 = vpack.c.bf16 %v69_v14, %v68_v13  ;;  %v38_v27 = vld [vmem:[%s701_s0 + $0x70] sm:$0xff]  ;;  %412 = vset.pattern.permute.xlu1 %v426_v15 }
  0x16   :  { %359 = vmatpush3.bf16.msra.mxu0 %v98_v62  ;;  %v39_v28 = vld [vmem:[%s701_s0 + $0x78] sm:$0xff]  ;;  %v70_v29 = vld [vmem:[%s701_s0 + $0x170] sm:$0xff]  ;;  %v125_v30 = vpack.c.bf16 %v87_v22, %v86_v20  ;;  %231 = vmatprep.mubr.bf16.mxu1 %v418_v23  ;;  %v88_v34 = vld [vmem:[%s701_s0 + $0x200] sm:$0xff] }
  0x17   :  { %381 = vmatpush3.bf16.msra.mxu1 %v114_v0  ;;  %360 = vmatprep.subr.bf16.mxu0 %v107_v1  ;;  %v71_v31 = vld [vmem:[%s701_s0 + $0x178] sm:$0xff]  ;;  %v101_v32 = vpack.c.bf16 %v39_v28, %v38_v27  ;;  %v89_v35 = vld [vmem:[%s701_s0 + $0x208] sm:$0xff]  ;;  %v413_v36 = vld [vmem:[%s702_s1] ss:$20 sps:$4 sm:$0xff]  }
  0x18   :  { %382 = vmatprep.subr.bf16.mxu1 %v123_v5  ;;  %v117_v33 = vpack.c.bf16 %v71_v31, %v70_v29  ;;  %v416_v37 = vld [vmem:[%s702_s1 + $0x8] ss:$20 sps:$4 sm:$0xff]   ;;  %v126_v38 = vpack.c.bf16 %v89_v35, %v88_v34  ;;  %v90_v40 = vld [vmem:[%s701_s0 + $0x210] sm:$0xff]  ;;  %v92_v43 = vld [vmem:[%s701_s0 + $0x220] sm:$0xff]  ;;  %411 = vset.pattern.permute.xlu0 %v426_v15 }
  0x19   :  { %v91_v41 = vld [vmem:[%s701_s0 + $0x218] sm:$0xff]  ;;  %v93_v44 = vld [vmem:[%s701_s0 + $0x228] sm:$0xff]  ;;  %v419_v46 = vld [vmem:[%s702_s1 + $0x10] ss:$20 sps:$4 sm:$0xff]  }
  0x1a   :  { %361 = vmatpush3.bf16.msra.mxu0 %v99_v12  ;;  %v127_v42 = vpack.c.bf16 %v91_v41, %v90_v40  ;;  %v128_v45 = vpack.c.bf16 %v93_v44, %v92_v43  ;;  %v281_v23 = vld [vmem:[%s704_s2] sm:$0xff]  ;;  %v284_v29 = vld [vmem:[%s703_s3 + $0x8] sm:$0xff] }
  0x1b   :  { %383 = vmatpush3.bf16.msra.mxu1 %v115_v16  ;;  %362 = vmatprep.subr.bf16.mxu0 %v108_v17  ;;  %v283_v16 = vld [vmem:[%s703_s3] sm:$0xff] }
  0x1c   :  { %384 = vmatprep.subr.bf16.mxu1 %v124_v19 }
  0x1e   :  { %363 = vmatpush3.bf16.msra.mxu0 %v100_v24 }
  0x1f   :  { %385 = vmatpush3.bf16.msra.mxu1 %v116_v25  ;;  %364 = vmatprep.subr.bf16.mxu0 %v109_v26  ;;  %v282_v26 = vld [vmem:[%s704_s2 + $0x8] sm:$0xff] }
  0x20   :  { %386 = vmatprep.subr.bf16.mxu1 %v125_v30 }
  0x22   :  { %365 = vmatpush3.bf16.msra.mxu0 %v101_v32 }
  0x23   :  { %387 = vmatpush3.bf16.msra.mxu1 %v117_v33  ;;  %398 = vmatprep.subr.bf16.mxu0 %v424_v39 }
  0x25   :  { %191 = vmatmul.mubr.bf16.vlgmr.msra.gmra.mrb[0].mxu0 %v413_v36 }
  0x26   :  { %232 = vmatmul.mubr.bf16.vlgmr.msra.gmra.mrb[0].mxu1 %v416_v37  ;;  %399 = vmatpush3.bf16.msra.mxu0 %v126_v38 }
  0x27   :  { %400 = vmatprep.subr.bf16.mxu0 %v424_v39  ;;  %404 = vmatprep.mubr.msk.bf16.mxu0 %vm425_vm0, %v424_v39 }
  0x2a   :  { %401 = vmatpush3.bf16.msra.mxu0 %v127_v42 }
  0x2b   :  { %402 = vmatprep.subr.bf16.mxu0 %v424_v39 }
  0x2e   :  { %403 = vmatpush3.bf16.msra.mxu0 %v128_v45 }
  0x31   :  { %405 = vmatmul.mubr.msk.bf16.vlgmr.msra.gmra.mrb[4].mxu0 %vm154_vm1, %v419_v46 }
  0xf8   :  { %v366_v47 = vpop.f32.mrb[0].mxu0 }
  0xf9   :  { %v388_v48 = vpop.f32.mrb[0].mxu1  ;;  %v367_v49 = vpop.f32.mrb[1].mxu0 }
  0xfa   :  { %v368_v50 = vadd.f32 %v367_v49, %v366_v47  ;;  %v389_v51 = vpop.f32.mrb[1].mxu1  ;;  %v369_v52 = vpop.f32.mrb[2].mxu0 }
  0xfb   :  { %v390_v53 = vadd.f32 %v389_v51, %v388_v48  ;;  %v391_v54 = vpop.f32.mrb[2].mxu1  ;;  %v370_v55 = vpop.f32.mrb[3].mxu0 }
  0xfc   :  { %v371_v56 = vadd.f32 %v370_v55, %v369_v52  ;;  %v392_v57 = vpop.f32.mrb[3].mxu1 }
  0xfd   :  { %v393_v58 = vadd.f32 %v392_v57, %v391_v54  ;;  %v234_v59 = vadd.f32 %v390_v53, %v368_v50 }
  0xff   :  { %v237_v60 = vadd.f32 %v393_v58, %v371_v56 }
 0x104   :  { %v274_v61 = vpop.f32.mrb[4].mxu0 }
 0x105   :  { %v275_v62 = vadd.f32 %v274_v61, %v234_v59  ;;  %v406_v63 = vpop.f32.mrb[5].mxu0 }
 0x106   :  { %v277_v0 = vpop.f32.mrb[6].mxu0 }
 0x107   :  { %v278_v1 = vadd.f32 %v277_v0, %v237_v60  ;;  %v407_v2 = vpop.f32.mrb[7].mxu0  ;;  %v286_v3 = vsel %vm285_vm2, %v275_v62, 0.0 }
 0x108   :  { %287 = vadd.xlane.f32.xlu0 %v286_v3 }
 0x109   :  { %v289_v4 = vsel %vm285_vm2, %v278_v1, 0.0 }
 0x10c   :  { %290 = vadd.xlane.f32.xlu0 %v289_v4 }
 0x195   :  { %v288_v5 = vpop.xlane.xlu0 %287 }
 0x196   :  { %v292_v6 = vmul.f32 0.015625, %v288_v5 }
 0x198   :  { %v294_v7 = vsub.f32 %v275_v62, %v292_v6 }
 0x199   :  { %v291_v8 = vpop.xlane.xlu0 %290 }
 0x19a   :  { %v293_v9 = vmul.f32 0.015625, %v291_v8  ;;  %v296_v10 = vmul.f32 %v294_v7, %v294_v7 }
 0x19c   :  { %v295_v11 = vsub.f32 %v278_v1, %v293_v9  ;;  %v298_v12 = vsel %vm285_vm2, %v296_v10, 0.0 }
 0x19d   :  { %299 = vadd.xlane.f32.xlu1 %v298_v12 }
 0x19e   :  { %v297_v13 = vmul.f32 %v295_v11, %v295_v11 }
 0x1a0   :  { %v301_v14 = vsel %vm285_vm2, %v297_v13, 0.0 }
 0x1a1   :  { %302 = vadd.xlane.f32.xlu1 %v301_v14 }
 0x1b2   :  { %326 = vperm.xlu1 %412, %v283_v16  }
 0x22a   :  { %v300_v17 = vpop.xlane.xlu1 %299 }
 0x22b   :  { %v304_v18 = vmul.f32 0.015625, %v300_v17 }
 0x22d   :  { %v306_v19 = vadd.f32 1e-05, %v304_v18 }
 0x22e   :  { %v303_v20 = vpop.xlane.xlu1 %302 }
 0x22f   :  { %420 = vrsqrt.f32 %v306_v19  ;;  %v305_v21 = vmul.f32 0.015625, %v303_v20 }
 0x231   :  { %v307_v22 = vadd.f32 1e-05, %v305_v21 }
 0x232   :  { %v327_v30 = vpop.permute.xlu1 %326 }
 0x233   :  { %422 = vrsqrt.f32 %v307_v22 }
 0x239   :  { %v421_v24 = vpop.eup %420 }
 0x23a   :  { %v310_v25 = vmul.f32 %v421_v24, %v281_v23 }
 0x23c   :  { %314 = vperm.xlu0 %411, %v310_v25  }
 0x23d   :  { %v423_v27 = vpop.eup %422 }
 0x23e   :  { %v311_v28 = vmul.f32 %v423_v27, %v282_v26 }
 0x240   :  { %319 = vperm.xlu1 %412, %v311_v28  }
 0x244   :  { %331 = vperm.xlu1 %412, %v284_v29  }
 0x2bb   :  { %v315_v31 = vpop.permute.xlu0 %314 }
 0x2bc   :  { %v322_v32 = vmul.f32 %v315_v31, %v294_v7 }
 0x2be   :  { %v334_v33 = vadd.f32 %v327_v30, %v322_v32 }
 0x2bf   :  { %v320_v34 = vpop.permute.xlu1 %319 }
 0x2c0   :  { %v336_v35 = vmax.f32 %v334_v33, 0.0  ;;  %v323_v36 = vmul.f32 %v320_v34, %v295_v11 }
 0x2c2   :  { %338 = vst.msk [vmem:[%s705_s4] sm:$0xff] %vm285_vm2, %v336_v35 }
 0x2c3   :  { %v332_v37 = vpop.permute.xlu1 %331 }
 0x2c4   :  { %v335_v38 = vadd.f32 %v332_v37, %v323_v36 }
 0x2c6   :  { %v337_v39 = vmax.f32 %v335_v38, 0.0 }
 0x2c8   :  { %339 = vst.msk [vmem:[%s705_s4 + $0x8] sm:$0xff] %vm285_vm2, %v337_v39 }

// kernel: densenet_forward.8
= control target key start
LH: loop header
LB: loop body
LE: loop exit
PB: predicated region body
PF: predicated region fallthrough
CT: control target
= control target key end

     0   :  { %vm23_vm0 = vcmask 130048   ;;  %vm30_vm1 = vcmask 125952   ;;  %v119_v21 = vmov 0   ;;  %s185_s0 = inlined_call_operand.vmem [shape: f32[20,16], index: 0, kind: input, shape index: {}]   ;;  %s186_s2 = inlined_call_operand.vmem [shape: f32[20,1], index: 2, kind: input, shape index: {}]   ;;  %s187_s1 = inlined_call_operand.vmem [shape: f32[20,1], index: 1, kind: input, shape index: {}]   ;;  %s188_s3 = inlined_call_operand.vmem [shape: f32[20,16], index: 3, kind: output, shape index: {}]  }
   0x1   :  { %v14_v0 = vld [vmem:[%s185_s0] sm:$0xff]  ;;  %v15_v1 = vld [vmem:[%s185_s0 + $0x8] sm:$0xff]  ;;  %v16_v2 = vld [vmem:[%s185_s0 + $0x10] sm:$0xf]  ;;  %112 = vset.pattern.permute.xlu1 %v119_v21  ;;  %111 = vset.pattern.permute.xlu0 %v119_v21 }
   0x2   :  { %v24_v3 = vsel %vm23_vm0, %v14_v0, 0.0  ;;  %v31_v4 = vsel %vm30_vm1, %v16_v2, 0.0  ;;  %v27_v5 = vsel %vm23_vm0, %v15_v1, 0.0  ;;  %v20_v22 = vld [vmem:[%s186_s2] sm:$0xff]  ;;  %v21_v23 = vld [vmem:[%s186_s2 + $0x8] sm:$0xff] }
   0x3   :  { %25 = vadd.xlane.f32.xlu0 %v24_v3  ;;  %32 = vadd.xlane.f32.xlu1 %v31_v4  ;;  %v17_v33 = vld [vmem:[%s187_s1] sm:$0xff]  ;;  %v18_v36 = vld [vmem:[%s187_s1 + $0x8] sm:$0xff]  ;;  %v19_v38 = vld [vmem:[%s187_s1 + $0x10] sm:$0xf] }
   0x4   :  { %v22_v42 = vld [vmem:[%s186_s2 + $0x10] sm:$0xf] }
   0x7   :  { %28 = vadd.xlane.f32.xlu0 %v27_v5 }
  0x90   :  { %v26_v6 = vpop.xlane.xlu0 %25  ;;  %v33_v7 = vpop.xlane.xlu1 %32 }
  0x91   :  { %v34_v8 = vmul.f32 0.0625, %v26_v6  ;;  %v36_v9 = vmul.f32 0.0625, %v33_v7 }
  0x93   :  { %v37_v10 = vsub.f32 %v14_v0, %v34_v8  ;;  %v39_v11 = vsub.f32 %v16_v2, %v36_v9 }
  0x94   :  { %v29_v12 = vpop.xlane.xlu0 %28 }
  0x95   :  { %v35_v13 = vmul.f32 0.0625, %v29_v12  ;;  %v40_v14 = vmul.f32 %v37_v10, %v37_v10  ;;  %v42_v15 = vmul.f32 %v39_v11, %v39_v11 }
  0x97   :  { %v38_v16 = vsub.f32 %v15_v1, %v35_v13  ;;  %v43_v17 = vsel %vm23_vm0, %v40_v14, 0.0  ;;  %v49_v19 = vsel %vm30_vm1, %v42_v15, 0.0 }
  0x98   :  { %44 = vadd.xlane.f32.xlu1 %v43_v17 }
  0x99   :  { %v41_v18 = vmul.f32 %v38_v16, %v38_v16 }
  0x9b   :  { %v46_v20 = vsel %vm23_vm0, %v41_v18, 0.0 }
  0x9c   :  { %47 = vadd.xlane.f32.xlu0 %v46_v20  ;;  %50 = vadd.xlane.f32.xlu1 %v49_v19 }
  0xad   :  { %84 = vperm.xlu1 %112, %v20_v22  }
  0xb1   :  { %89 = vperm.xlu1 %112, %v21_v23  }
 0x125   :  { %v45_v24 = vpop.xlane.xlu1 %44 }
 0x126   :  { %v52_v25 = vmul.f32 0.0625, %v45_v24 }
 0x128   :  { %v55_v26 = vadd.f32 1e-05, %v52_v25 }
 0x129   :  { %v48_v27 = vpop.xlane.xlu0 %47  ;;  %v51_v28 = vpop.xlane.xlu1 %50 }
 0x12a   :  { %113 = vrsqrt.f32 %v55_v26  ;;  %v53_v29 = vmul.f32 0.0625, %v48_v27  ;;  %v54_v30 = vmul.f32 0.0625, %v51_v28 }
 0x12c   :  { %v56_v31 = vadd.f32 1e-05, %v53_v29  ;;  %v57_v32 = vadd.f32 1e-05, %v54_v30 }
 0x12d   :  { %v85_v43 = vpop.permute.xlu1 %84 }
 0x12e   :  { %115 = vrsqrt.f32 %v56_v31 }
 0x12f   :  { %117 = vrsqrt.f32 %v57_v32 }
 0x131   :  { %v90_v44 = vpop.permute.xlu1 %89 }
 0x134   :  { %v114_v34 = vpop.eup %113 }
 0x135   :  { %v61_v35 = vmul.f32 %v114_v34, %v17_v33 }
 0x137   :  { %66 = vperm.xlu0 %111, %v61_v35  }
 0x138   :  { %v116_v37 = vpop.eup %115 }
 0x139   :  { %v118_v39 = vpop.eup %117  ;;  %v62_v40 = vmul.f32 %v116_v37, %v18_v36 }
 0x13a   :  { %v63_v41 = vmul.f32 %v118_v39, %v19_v38 }
 0x13b   :  { %71 = vperm.xlu1 %112, %v62_v40  }
 0x13f   :  { %76 = vperm.xlu1 %112, %v63_v41  }
 0x143   :  { %94 = vperm.xlu1 %112, %v22_v42  }
 0x1b6   :  { %v67_v45 = vpop.permute.xlu0 %66 }
 0x1b7   :  { %v79_v46 = vmul.f32 %v67_v45, %v37_v10 }
 0x1b9   :  { %v97_v47 = vadd.f32 %v85_v43, %v79_v46 }
 0x1ba   :  { %v72_v48 = vpop.permute.xlu1 %71 }
 0x1bb   :  { %v100_v49 = vmax.f32 %v97_v47, 0.0  ;;  %v80_v50 = vmul.f32 %v72_v48, %v38_v16 }
 0x1bd   :  { %103 = vst.msk [vmem:[%s188_s3] sm:$0xff] %vm23_vm0, %v100_v49  ;;  %v98_v51 = vadd.f32 %v90_v44, %v80_v50 }
 0x1be   :  { %v77_v52 = vpop.permute.xlu1 %76 }
 0x1bf   :  { %v101_v53 = vmax.f32 %v98_v51, 0.0  ;;  %v81_v54 = vmul.f32 %v77_v52, %v39_v11 }
 0x1c1   :  { %104 = vst.msk [vmem:[%s188_s3 + $0x8] sm:$0xff] %vm23_vm0, %v101_v53 }
 0x1c2   :  { %v95_v55 = vpop.permute.xlu1 %94 }
 0x1c3   :  { %v99_v56 = vadd.f32 %v95_v55, %v81_v54 }
 0x1c5   :  { %v102_v57 = vmax.f32 %v99_v56, 0.0 }
 0x1c7   :  { %105 = vst.msk [vmem:[%s188_s3 + $0x10] sm:$0xf] %vm30_vm1, %v102_v57 }

// kernel: densenet_forward.6
= control target key start
LH: loop header
LB: loop body
LE: loop exit
PB: predicated region body
PF: predicated region fallthrough
CT: control target
= control target key end

     0   :  { %vm62_vm0 = vcmask 261120   ;;  %v756_v16 = vmov 0   ;;  %v757_v31 = vmov 0.0   ;;  %vm758_vm1 = vmmov 0   ;;  %s761_s19 = smov 127   ;;  %s1051_s0 = inlined_call_operand.vmem [shape: f32[16,32], index: 0, kind: input, shape index: {}]   ;;  %s1052_s4 = inlined_call_operand.vmem [shape: f32[16,1], index: 4, kind: input, shape index: {}]   ;;  %s1053_s3 = inlined_call_operand.vmem [shape: f32[16,1], index: 3, kind: input, shape index: {}]   ;;  %s1054_s5 = inlined_call_operand.vmem [shape: bf16[8,16], index: 5, kind: input, shape index: {}]   ;;  %s1055_s7 = inlined_call_operand.vmem [shape: f32[8,1], index: 7, kind: input, shape index: {}]   ;;  %s1056_s6 = inlined_call_operand.vmem [shape: f32[8,1], index: 6, kind: input, shape index: {}]   ;;  %s1057_s1 = inlined_call_operand.vmem [shape: f32[1,32], index: 1, kind: input, shape index: {}]   ;;  %s1058_s2 = inlined_call_operand.vmem [shape: f32[1,32], index: 2, kind: input, shape index: {}]   ;;  %s1059_s8 = inlined_call_operand.vmem [shape: bf16[4,24], index: 8, kind: input, shape index: {}]   ;;  %s1060_s9 = inlined_call_operand.vmem [shape: f32[20,1], index: 9, kind: input, shape index: {}]   ;;  %s1061_s10 = inlined_call_operand.vmem [shape: f32[20,1], index: 10, kind: input, shape index: {}]   ;;  %s1062_s11 = inlined_call_operand.vmem [shape: bf16[8,20], index: 11, kind: input, shape index: {}]   ;;  %s1063_s13 = inlined_call_operand.vmem [shape: f32[8,1], index: 13, kind: input, shape index: {}]   ;;  %s1064_s12 = inlined_call_operand.vmem [shape: f32[8,1], index: 12, kind: input, shape index: {}]   ;;  %s1065_s14 = inlined_call_operand.vmem [shape: bf16[4,24], index: 14, kind: input, shape index: {}]   ;;  %s1066_s15 = inlined_call_operand.vmem [shape: f32[24,1], index: 15, kind: input, shape index: {}]   ;;  %s1067_s16 = inlined_call_operand.vmem [shape: f32[24,1], index: 16, kind: input, shape index: {}]   ;;  %s1068_s17 = inlined_call_operand.vmem [shape: bf16[12,24], index: 17, kind: input, shape index: {}]   ;;  %s1069_s18 = inlined_call_operand.vmem [shape: f32[12,32], index: 18, kind: output, shape index: {}]  }
   0x1   :  { %1073 = sst [smem:[#allocation3_spill]] %s1051_s0  ;;  %734 = vset.pattern.permute.xlu1 %v756_v16  ;;  %733 = vset.pattern.permute.xlu0 %v756_v16  ;;  %v127_v43 = vld [vmem:[%s1054_s5] sm:$0xf]  ;;  %vm129_vm2 = vcmask 130048   ;;  %vm201_vm3 = vcmask 1047808   ;;  %vm762_vm7 = vmmov 1  }
   0x2   :  { %1074 = sst [smem:[#allocation4_spill]] %s1052_s4  ;;  %s1076_s29 = sld [smem:[#allocation3_spill]]  ;;  %688 = vmatprep.subr.bf16.mxu0 %v757_v31  ;;  %694 = vmatprep.subr.bf16.mxu1 %v757_v31  ;;  %v174_v54 = vld [vmem:[%s1055_s7] sm:$0xff]  ;;  %vm236_vm10 = vcmask 1043456   ;;  %vm232_vm11 = vcmask 195584   ;;  %vm280_vm12 = vcmask 257024  }
   0x3   :  { %1075 = sst [smem:[#allocation5_spill]] %s1053_s3  ;;  %s1077_s20 = sld [smem:[#allocation4_spill]]  ;;  %690 = vmatprep.mubr.msk.bf16.mxu0 %vm758_vm1, %v757_v31  ;;  %698 = vmatprep.mubr.msk.bf16.mxu1 %vm758_vm1, %v757_v31  ;;  %v173_v58 = vld [vmem:[%s1056_s6] sm:$0xff]  ;;  %vm376_vm13 = vcmask 1041408   ;;  %vm372_vm14 = vcmask 162816  }
   0x4   :  { %s1078_s3 = sld [smem:[#allocation5_spill]]  ;;  %s759_s7 = smov 32  }
   0x5   :  { %s760_s6 = smov 97  }
   0x8   :  { %v60_v0 = vld [vmem:[%s1076_s29] sm:$0xff]  ;;  %v61_v1 = vld [vmem:[%s1076_s29 + $0x8] sm:$0xff] }
   0x9   :  { %63 = vst.msk [vmem:[#allocation2] sm:$0xff] %vm62_vm0, %v60_v0  ;;  %64 = vst.msk [vmem:[#allocation2 + $0x8] sm:$0xff] %vm62_vm0, %v61_v1  ;;  %v73_v17 = vld [vmem:[%s1077_s20] sm:$0xff]  ;;  %v74_v30 = vld [vmem:[%s1077_s20 + $0x8] sm:$0xff] }
   0xa   :  { %v71_v24 = vld [vmem:[%s1078_s3] sm:$0xff]  ;;  %v72_v27 = vld [vmem:[%s1078_s3 + $0x8] sm:$0xff] }
  0x10   :  { %v866_v2 = vld [vmem:[#allocation2] sm:$0xff]  ;;  %v868_v3 = vld [vmem:[#allocation2 + $0x8] sm:$0xff] }
  0x11   :  { %v872_v4 = vsel %vm62_vm0, %v866_v2, 0.0  ;;  %v877_v5 = vsel %vm62_vm0, %v868_v3, 0.0 }
  0x12   :  { %76 = vadd.xlane.f32.xlu0 %v872_v4 }
  0x16   :  { %79 = vadd.xlane.f32.xlu0 %v877_v5 }
  0x9f   :  { %v77_v6 = vpop.xlane.xlu0 %76 }
  0xa0   :  { %v81_v7 = vmul.f32 0.03125, %v77_v6 }
  0xa2   :  { %v83_v8 = vsub.f32 %v866_v2, %v81_v7 }
  0xa3   :  { %v80_v9 = vpop.xlane.xlu0 %79 }
  0xa4   :  { %v82_v10 = vmul.f32 0.03125, %v80_v9  ;;  %v85_v11 = vmul.f32 %v83_v8, %v83_v8 }
  0xa6   :  { %v84_v12 = vsub.f32 %v868_v3, %v82_v10  ;;  %v87_v13 = vsel %vm62_vm0, %v85_v11, 0.0  ;;  %v209_v10 = vlaneseq  ;;  %v65_v11 = vld [vmem:[%s1057_s1] sm:$0x1] }
  0xa7   :  { %88 = vadd.xlane.f32.xlu1 %v87_v13  ;;  %vm66_vm4 = vcmp.gt.f32.partialorder %v65_v11, 0.5 }
  0xa8   :  { %v86_v14 = vmul.f32 %v84_v12, %v84_v12 }
  0xaa   :  { %v90_v15 = vsel %vm62_vm0, %v86_v14, 0.0  ;;  %v67_v14 = vld [vmem:[%s1058_s2] sm:$0x1] }
  0xab   :  { %91 = vadd.xlane.f32.xlu1 %v90_v15  ;;  %v208_v15 = vsel %vm66_vm4, 1, %v756_v16  ;;  %vm68_vm5 = vcmp.gt.f32.partialorder %v67_v14, 0.5 }
  0xbc   :  { %115 = vperm.xlu1 %734, %v73_v17  }
 0x134   :  { %v89_v18 = vpop.xlane.xlu1 %88 }
 0x135   :  { %v93_v19 = vmul.f32 0.03125, %v89_v18  ;;  %v219_v18 = vsel %vm68_vm5, 1, %v756_v16 }
 0x137   :  { %v95_v20 = vadd.f32 1e-05, %v93_v19 }
 0x138   :  { %v92_v21 = vpop.xlane.xlu1 %91 }
 0x139   :  { %736 = vrsqrt.f32 %v95_v20  ;;  %v94_v22 = vmul.f32 0.03125, %v92_v21 }
 0x13b   :  { %v96_v23 = vadd.f32 1e-05, %v94_v22 }
 0x13c   :  { %v116_v32 = vpop.permute.xlu1 %115 }
 0x13d   :  { %738 = vrsqrt.f32 %v96_v23 }
 0x143   :  { %v737_v25 = vpop.eup %736 }
 0x144   :  { %v99_v26 = vmul.f32 %v737_v25, %v71_v24 }
 0x146   :  { %103 = vperm.xlu0 %733, %v99_v26   ;;  %v229_v26 = vld [vmem:[%s1059_s8] sm:$0x3] }
 0x147   :  { %v739_v28 = vpop.eup %738 }
 0x148   :  { %v100_v29 = vmul.f32 %v739_v28, %v72_v27 }
 0x14a   :  { %108 = vperm.xlu1 %734, %v100_v29  }
 0x14e   :  { %120 = vperm.xlu1 %734, %v74_v30  }
 0x1c5   :  { %v104_v33 = vpop.permute.xlu0 %103 }
 0x1c6   :  { %v111_v34 = vmul.f32 %v104_v33, %v83_v8 }
 0x1c8   :  { %v123_v36 = vadd.f32 %v116_v32, %v111_v34 }
 0x1c9   :  { %v109_v35 = vpop.permute.xlu1 %108 }
 0x1ca   :  { %v112_v37 = vmul.f32 %v109_v35, %v84_v12  ;;  %v125_v40 = vmax.f32 %v123_v36, 0.0  ;;  %v210_v12 = vshrl.u32 %v209_v10, 7 }
 0x1cc   :  { %v211_v13 = vsub.s32 0, %v210_v12 }
 0x1cd   :  { %v121_v38 = vpop.permute.xlu1 %120 }
 0x1ce   :  { %v124_v39 = vadd.f32 %v121_v38, %v112_v37  ;;  %v212_v17 = vrot.slane %v208_v15, %v211_v13  ;;  %v934_v19 = vrot.slane %v219_v18, %v211_v13 }
 0x1d0   :  { %v126_v41 = vmax.f32 %v124_v39, 0.0  ;;  %vm213_vm6 = vcmp.eq.s32.totalorder %v212_v17, 1  ;;  %vm224_vm9 = vcmp.eq.s32.totalorder %v934_v19, 1 }
 0x1d1   :  { %vm936_vm8 = vmpackc.low %vm762_vm7, %vm213_vm6 }
 0x1d2   :  { %v128_v42 = vpack.c.bf16 %v126_v41, %v125_v40 }
 0x1d4   :  { %689 = vmatpush3.bf16.msra.mxu0 %v128_v42 }
 0x1d5   :  { %702 = vmatprep.subr.bf16.mxu0 %v757_v31 }
 0x1d7   :  { %691 = vmatmul.mubr.msk.bf16.vlgmr.msra.gmra.mrb[0].mxu0 %vm129_vm2, %v127_v43 }
 0x1d8   :  { %706 = vmatprep.mubr.msk.bf16.mxu0 %vm758_vm1, %v757_v31 }
 0x2aa   :  { %v167_v44 = vpop.f32.mrb[0].mxu0 }
 0x2ab   :  { %v692_v45 = vpop.f32.mrb[1].mxu0  ;;  %v175_v46 = vsel %vm62_vm0, %v167_v44, 0.0 }
 0x2ac   :  { %176 = vadd.xlane.f32.xlu1 %v175_v46  ;;  %v170_v47 = vpop.f32.mrb[2].mxu0 }
 0x2ad   :  { %v693_v48 = vpop.f32.mrb[3].mxu0 }
 0x2ae   :  { %v285_v48 = vld [vmem:[%s1060_s9] sm:$0xff] }
 0x339   :  { %v177_v49 = vpop.xlane.xlu1 %176 }
 0x33a   :  { %v178_v50 = vmul.f32 0.03125, %v177_v49 }
 0x33c   :  { %v179_v51 = vsub.f32 %v167_v44, %v178_v50  ;;  %v289_v50 = vld [vmem:[%s1061_s10 + $0x8] sm:$0xff] }
 0x33e   :  { %v180_v52 = vmul.f32 %v179_v51, %v179_v51 }
 0x340   :  { %v181_v53 = vsel %vm62_vm0, %v180_v52, 0.0 }
 0x341   :  { %182 = vadd.xlane.f32.xlu0 %v181_v53 }
 0x357   :  { %196 = vperm.xlu0 %733, %v174_v54  }
 0x376   :  { %295 = vadd.xlane.f32.xlu0 %v877_v5 }
 0x3ce   :  { %v183_v55 = vpop.xlane.xlu0 %182 }
 0x3cf   :  { %v184_v56 = vmul.f32 0.03125, %v183_v55 }
 0x3d1   :  { %v185_v57 = vadd.f32 1e-05, %v184_v56 }
 0x3d3   :  { %740 = vrsqrt.f32 %v185_v57 }
 0x3d6   :  { %v197_v63 = vpop.permute.xlu0 %196 }
 0x3dd   :  { %v741_v59 = vpop.eup %740 }
 0x3de   :  { %v187_v60 = vmul.f32 %v741_v59, %v173_v58 }
 0x3e0   :  { %190 = vperm.xlu1 %734, %v187_v60   ;;  %v286_v60 = vld [vmem:[%s1060_s9 + $0x8] sm:$0xff] }
 0x403   :  { %v296_v33 = vpop.xlane.xlu0 %295 }
 0x404   :  { %v301_v34 = vmul.f32 0.03125, %v296_v33 }
 0x406   :  { %v304_v39 = vsub.f32 %v868_v3, %v301_v34 }
 0x408   :  { %v307_v40 = vmul.f32 %v304_v39, %v304_v39 }
 0x40a   :  { %v312_v44 = vsel %vm62_vm0, %v307_v40, 0.0 }
 0x45f   :  { %v191_v61 = vpop.permute.xlu1 %190 }
 0x460   :  { %v193_v62 = vmul.f32 %v191_v61, %v179_v51  ;;  %v290_v51 = vld [vmem:[%s1061_s10 + $0x10] sm:$0xf] }
 0x462   :  { %v199_v0 = vadd.f32 %v197_v63, %v193_v62  ;;  %v288_v63 = vld [vmem:[%s1061_s10] sm:$0xff] }
 0x464   :  { %v200_v1 = vmax.f32 %v199_v0, 0.0 }
 0x466   :  { %202 = vrot.lane.b32.xlu1 %v200_v1, %s759_s7 }
 0x4d8   :  { %v203_v6 = vpop.permute.xlu1 %202 }
 0x4d9   :  { %v204_v7 = vsel %vm201_vm3, %v203_v6, %v200_v1 }
 0x4da   :  { %205 = vrot.lane.b32.xlu1 %v204_v7, %s759_s7 }
 0x54c   :  { %v206_v8 = vpop.permute.xlu1 %205 }
 0x54d   :  { %v207_v9 = vsel %vm201_vm3, %v206_v8, %v200_v1 }
 0x54e   :  { %215 = vrot.lane.b32.xlu1 %v207_v9, %s760_s6 }
 0x552   :  { %225 = vrot.lane.b32.xlu1 %v207_v9, %s761_s19 }
 0x576   :  { %292 = vadd.xlane.f32.xlu1 %v872_v4 }
 0x5c0   :  { %v216_v20 = vpop.permute.xlu1 %215 }
 0x5c1   :  { %v664_v22 = vpack.c.bf16 %v200_v1, %v216_v20  ;;  %v287_v20 = vld [vmem:[%s1060_s9 + $0x10] sm:$0xf] }
 0x5c3   :  { %695 = vmatpush3.bf16.msk.msra.mxu1 %vm936_vm8, %v664_v22 }
 0x5c4   :  { %v226_v23 = vpop.permute.xlu1 %225  ;;  %696 = vmatprep.subr.bf16.mxu1 %v757_v31 }
 0x5c5   :  { %v228_v16 = vsel %vm224_vm9, %v226_v23, 0.0 }
 0x5c6   :  { %v231_v24 = vpack.c.bf16 %v228_v16, %v228_v16 }
 0x5c8   :  { %v238_v25 = vsel %vm236_vm10, %v231_v24, 0 }
 0x5c9   :  { %697 = vmatpush3.bf16.msra.mxu1 %v238_v25 }
 0x5ca   :  { %710 = vmatprep.subr.bf16.mxu1 %v757_v31 }
 0x5cc   :  { %699 = vmatmul.mubr.msk.bf16.vlgmr.msra.gmra.mrb[0].mxu1 %vm232_vm11, %v229_v26 }
 0x5cd   :  { %714 = vmatprep.mubr.msk.bf16.mxu1 %vm758_vm1, %v757_v31 }
 0x603   :  { %v293_v27 = vpop.xlane.xlu1 %292 }
 0x604   :  { %v300_v28 = vmul.f32 0.03125, %v293_v27 }
 0x606   :  { %v303_v29 = vsub.f32 %v866_v2, %v300_v28 }
 0x608   :  { %v306_v30 = vmul.f32 %v303_v29, %v303_v29 }
 0x60a   :  { %v309_v32 = vsel %vm62_vm0, %v306_v30, 0.0  ;;  %v369_v30 = vld [vmem:[%s1062_s11] sm:$0xf] }
 0x60b   :  { %310 = vadd.xlane.f32.xlu1 %v309_v32 }
 0x698   :  { %v311_v42 = vpop.xlane.xlu1 %310 }
 0x699   :  { %v318_v45 = vmul.f32 0.03125, %v311_v42 }
 0x69b   :  { %v321_v46 = vadd.f32 1e-05, %v318_v45 }
 0x69d   :  { %742 = vrsqrt.f32 %v321_v46  ;;  %v420_v46 = vld [vmem:[%s1064_s12] sm:$0xff] }
 0x69f   :  { %v274_v35 = vpop.f32.mrb[0].mxu1 }
 0x6a0   :  { %281 = vst.msk [vmem:[#allocation2 + $0x10] sm:$0xf] %vm280_vm12, %v274_v35  ;;  %v700_v36 = vpop.f32.mrb[1].mxu1 }
 0x6a1   :  { %v277_v37 = vpop.f32.mrb[2].mxu1 }
 0x6a2   :  { %v701_v38 = vpop.f32.mrb[3].mxu1  ;;  %v421_v37 = vld [vmem:[%s1063_s13] sm:$0xff] }
 0x6a7   :  { %v284_v41 = vld [vmem:[#allocation2 + $0x10] sm:$0xf]  ;;  %v743_v47 = vpop.eup %742 }
 0x6a8   :  { %v297_v43 = vsel %vm280_vm12, %v284_v41, 0.0  ;;  %v327_v49 = vmul.f32 %v743_v47, %v285_v48 }
 0x6a9   :  { %298 = vadd.xlane.f32.xlu0 %v297_v43 }
 0x6ad   :  { %313 = vadd.xlane.f32.xlu0 %v312_v44 }
 0x6c3   :  { %332 = vperm.xlu0 %733, %v327_v49  }
 0x6c7   :  { %355 = vperm.xlu0 %733, %v289_v50  }
 0x6cb   :  { %360 = vperm.xlu0 %733, %v290_v51  }
 0x736   :  { %v299_v52 = vpop.xlane.xlu0 %298 }
 0x737   :  { %v302_v53 = vmul.f32 0.03125, %v299_v52 }
 0x739   :  { %v305_v54 = vsub.f32 %v284_v41, %v302_v53 }
 0x73a   :  { %v314_v55 = vpop.xlane.xlu0 %313 }
 0x73b   :  { %v319_v56 = vmul.f32 0.03125, %v314_v55  ;;  %v308_v57 = vmul.f32 %v305_v54, %v305_v54 }
 0x73d   :  { %v322_v58 = vadd.f32 1e-05, %v319_v56  ;;  %v315_v59 = vsel %vm280_vm12, %v308_v57, 0.0 }
 0x73e   :  { %316 = vadd.xlane.f32.xlu1 %v315_v59 }
 0x73f   :  { %744 = vrsqrt.f32 %v322_v58 }
 0x742   :  { %v333_v0 = vpop.permute.xlu0 %332 }
 0x743   :  { %v345_v11 = vmul.f32 %v333_v0, %v303_v29 }
 0x746   :  { %v356_v10 = vpop.permute.xlu0 %355 }
 0x749   :  { %v745_v61 = vpop.eup %744 }
 0x74a   :  { %v328_v62 = vmul.f32 %v745_v61, %v286_v60  ;;  %v361_v25 = vpop.permute.xlu0 %360 }
 0x74f   :  { %337 = vperm.xlu1 %734, %v328_v62  }
 0x753   :  { %350 = vperm.xlu1 %734, %v288_v63  }
 0x7cb   :  { %v317_v1 = vpop.xlane.xlu1 %316 }
 0x7cc   :  { %v320_v6 = vmul.f32 0.03125, %v317_v1 }
 0x7ce   :  { %v323_v7 = vadd.f32 1e-05, %v320_v6 }
 0x7cf   :  { %v338_v8 = vpop.permute.xlu1 %337 }
 0x7d0   :  { %746 = vrsqrt.f32 %v323_v7  ;;  %v346_v9 = vmul.f32 %v338_v8, %v304_v39 }
 0x7d2   :  { %v364_v12 = vadd.f32 %v356_v10, %v346_v9 }
 0x7d3   :  { %v351_v13 = vpop.permute.xlu1 %350 }
 0x7d4   :  { %v363_v14 = vadd.f32 %v351_v13, %v345_v11  ;;  %v367_v15 = vmax.f32 %v364_v12, 0.0 }
 0x7d6   :  { %v366_v17 = vmax.f32 %v363_v14, 0.0 }
 0x7d8   :  { %v370_v18 = vpack.c.bf16 %v367_v15, %v366_v17 }
 0x7da   :  { %v747_v22 = vpop.eup %746  ;;  %703 = vmatpush3.bf16.msra.mxu0 %v370_v18 }
 0x7db   :  { %v329_v23 = vmul.f32 %v747_v22, %v287_v20  ;;  %704 = vmatprep.subr.bf16.mxu0 %v757_v31 }
 0x7dd   :  { %342 = vperm.xlu1 %734, %v329_v23   ;;  %v516_v23 = vld [vmem:[%s1066_s15] sm:$0xff] }
 0x85c   :  { %v343_v16 = vpop.permute.xlu1 %342 }
 0x85d   :  { %v347_v24 = vmul.f32 %v343_v16, %v305_v54 }
 0x85f   :  { %v365_v26 = vadd.f32 %v361_v25, %v347_v24  ;;  %v521_v24 = vld [vmem:[%s1067_s16 + $0x10] sm:$0xff] }
 0x861   :  { %v368_v27 = vmax.f32 %v365_v26, 0.0 }
 0x863   :  { %v371_v28 = vpack.c.bf16 %v368_v27, %v368_v27 }
 0x865   :  { %v378_v29 = vsel %vm376_vm13, %v371_v28, 0 }
 0x866   :  { %705 = vmatpush3.bf16.msra.mxu0 %v378_v29 }
 0x867   :  { %718 = vmatprep.subr.bf16.mxu0 %v757_v31 }
 0x869   :  { %707 = vmatmul.mubr.msk.bf16.vlgmr.msra.gmra.mrb[4].mxu0 %vm372_vm14, %v369_v30 }
 0x86a   :  { %722 = vmatprep.mubr.msk.bf16.mxu0 %vm758_vm1, %v757_v31 }
 0x93c   :  { %v414_v32 = vpop.f32.mrb[4].mxu0 }
 0x93d   :  { %v708_v33 = vpop.f32.mrb[5].mxu0  ;;  %v422_v34 = vsel %vm62_vm0, %v414_v32, 0.0 }
 0x93e   :  { %423 = vadd.xlane.f32.xlu1 %v422_v34  ;;  %v417_v35 = vpop.f32.mrb[6].mxu0  ;;  %v517_v34 = vld [vmem:[%s1066_s15 + $0x8] sm:$0xff] }
 0x93f   :  { %v709_v36 = vpop.f32.mrb[7].mxu0 }
 0x94f   :  { %443 = vperm.xlu1 %734, %v421_v37   ;;  %v519_v37 = vld [vmem:[%s1067_s16] sm:$0xff] }
 0x9cb   :  { %v424_v38 = vpop.xlane.xlu1 %423 }
 0x9cc   :  { %v425_v39 = vmul.f32 0.03125, %v424_v38 }
 0x9ce   :  { %v426_v40 = vsub.f32 %v414_v32, %v425_v39 }
 0x9cf   :  { %v444_v51 = vpop.permute.xlu1 %443 }
 0x9d0   :  { %v427_v41 = vmul.f32 %v426_v40, %v426_v40 }
 0x9d2   :  { %v428_v42 = vsel %vm62_vm0, %v427_v41, 0.0 }
 0x9d3   :  { %429 = vadd.xlane.f32.xlu0 %v428_v42 }
 0xa60   :  { %v430_v43 = vpop.xlane.xlu0 %429 }
 0xa61   :  { %v431_v44 = vmul.f32 0.03125, %v430_v43 }
 0xa63   :  { %v432_v45 = vadd.f32 1e-05, %v431_v44 }
 0xa65   :  { %748 = vrsqrt.f32 %v432_v45 }
 0xa6f   :  { %v749_v47 = vpop.eup %748 }
 0xa70   :  { %v434_v48 = vmul.f32 %v749_v47, %v420_v46 }
 0xa72   :  { %437 = vperm.xlu0 %733, %v434_v48  }
 0xaf1   :  { %v438_v49 = vpop.permute.xlu0 %437 }
 0xaf2   :  { %v440_v50 = vmul.f32 %v438_v49, %v426_v40 }
 0xaf4   :  { %v446_v52 = vadd.f32 %v444_v51, %v440_v50 }
 0xaf6   :  { %v447_v53 = vmax.f32 %v446_v52, 0.0  ;;  %v518_v52 = vld [vmem:[%s1066_s15 + $0x10] sm:$0xff] }
 0xaf8   :  { %448 = vrot.lane.b32.xlu1 %v447_v53, %s759_s7 }
 0xb6a   :  { %v449_v54 = vpop.permute.xlu1 %448 }
 0xb6b   :  { %v450_v55 = vsel %vm201_vm3, %v449_v54, %v447_v53 }
 0xb6c   :  { %451 = vrot.lane.b32.xlu0 %v450_v55, %s759_s7 }
 0xbde   :  { %v452_v56 = vpop.permute.xlu0 %451 }
 0xbdf   :  { %v453_v57 = vsel %vm201_vm3, %v452_v56, %v447_v53 }
 0xbe0   :  { %459 = vrot.lane.b32.xlu0 %v453_v57, %s761_s19  ;;  %455 = vrot.lane.b32.xlu1 %v453_v57, %s760_s6 }
 0xbff   :  { %526 = vadd.xlane.f32.xlu0 %v877_v5  ;;  %v463_v5 = vld [vmem:[%s1065_s14] sm:$0x3] }
 0xc04   :  { %523 = vadd.xlane.f32.xlu1 %v872_v4 }
 0xc52   :  { %v460_v58 = vpop.permute.xlu0 %459  ;;  %v456_v59 = vpop.permute.xlu1 %455 }
 0xc53   :  { %v462_v60 = vsel %vm224_vm9, %v460_v58, 0.0  ;;  %v669_v61 = vpack.c.bf16 %v447_v53, %v456_v59 }
 0xc54   :  { %v465_v62 = vpack.c.bf16 %v462_v60, %v462_v60 }
 0xc55   :  { %711 = vmatpush3.bf16.msk.msra.mxu1 %vm936_vm8, %v669_v61 }
 0xc56   :  { %712 = vmatprep.subr.bf16.mxu1 %v757_v31  ;;  %v470_v63 = vsel %vm236_vm10, %v465_v62, 0  ;;  %v735_v62 = vld [vmem:[%s1068_s17] sm:$0x3f]  }
 0xc59   :  { %713 = vmatpush3.bf16.msra.mxu1 %v470_v63 }
 0xc5c   :  { %715 = vmatmul.mubr.msk.bf16.vlgmr.msra.gmra.mrb[4].mxu1 %vm232_vm11, %v463_v5 }
 0xc8c   :  { %v527_v21 = vpop.xlane.xlu0 %526 }
 0xc8d   :  { %v532_v7 = vmul.f32 0.03125, %v527_v21 }
 0xc8f   :  { %v535_v12 = vsub.f32 %v868_v3, %v532_v7  ;;  %v520_v3 = vld [vmem:[%s1067_s16 + $0x8] sm:$0xff] }
 0xc91   :  { %v524_v4 = vpop.xlane.xlu1 %523  ;;  %v538_v13 = vmul.f32 %v535_v12, %v535_v12 }
 0xc92   :  { %v531_v0 = vmul.f32 0.03125, %v524_v4 }
 0xc94   :  { %v534_v19 = vsub.f32 %v866_v2, %v531_v0  ;;  %v543_v2 = vsel %vm62_vm0, %v538_v13, 0.0 }
 0xc96   :  { %v537_v1 = vmul.f32 %v534_v19, %v534_v19 }
 0xc98   :  { %v540_v6 = vsel %vm62_vm0, %v537_v1, 0.0 }
 0xc99   :  { %541 = vadd.xlane.f32.xlu1 %v540_v6 }
 0xd26   :  { %v542_v15 = vpop.xlane.xlu1 %541 }
 0xd27   :  { %v549_v18 = vmul.f32 0.03125, %v542_v15 }
 0xd29   :  { %v552_v20 = vadd.f32 1e-05, %v549_v18 }
 0xd2b   :  { %750 = vrsqrt.f32 %v552_v20 }
 0xd2f   :  { %v506_v8 = vpop.f32.mrb[4].mxu1 }
 0xd30   :  { %512 = vst.msk [vmem:[#allocation2 + $0x14] sm:$0xf] %vm280_vm12, %v506_v8  ;;  %v716_v9 = vpop.f32.mrb[5].mxu1 }
 0xd31   :  { %v509_v10 = vpop.f32.mrb[6].mxu1 }
 0xd32   :  { %v717_v11 = vpop.f32.mrb[7].mxu1 }
 0xd35   :  { %v751_v22 = vpop.eup %750 }
 0xd36   :  { %v558_v16 = vmul.f32 %v751_v22, %v516_v23 }
 0xd37   :  { %v515_v14 = vld [vmem:[#allocation2 + $0x10] sm:$0xff] }
 0xd38   :  { %v528_v17 = vsel %vm62_vm0, %v515_v14, 0.0 }
 0xd39   :  { %529 = vadd.xlane.f32.xlu0 %v528_v17 }
 0xd3d   :  { %544 = vadd.xlane.f32.xlu0 %v543_v2 }
 0xd53   :  { %563 = vperm.xlu0 %733, %v558_v16  }
 0xd57   :  { %586 = vperm.xlu0 %733, %v520_v3  }
 0xd5b   :  { %591 = vperm.xlu0 %733, %v521_v24  }
 0xdc6   :  { %v530_v25 = vpop.xlane.xlu0 %529 }
 0xdc7   :  { %v533_v26 = vmul.f32 0.03125, %v530_v25 }
 0xdc9   :  { %v536_v27 = vsub.f32 %v515_v14, %v533_v26 }
 0xdca   :  { %v545_v28 = vpop.xlane.xlu0 %544 }
 0xdcb   :  { %v550_v29 = vmul.f32 0.03125, %v545_v28  ;;  %v539_v30 = vmul.f32 %v536_v27, %v536_v27 }
 0xdcd   :  { %v553_v32 = vadd.f32 1e-05, %v550_v29  ;;  %v546_v33 = vsel %vm62_vm0, %v539_v30, 0.0 }
 0xdce   :  { %547 = vadd.xlane.f32.xlu1 %v546_v33 }
 0xdcf   :  { %752 = vrsqrt.f32 %v553_v32 }
 0xdd2   :  { %v564_v38 = vpop.permute.xlu0 %563 }
 0xdd3   :  { %v576_v45 = vmul.f32 %v564_v38, %v534_v19 }
 0xdd6   :  { %v587_v44 = vpop.permute.xlu0 %586 }
 0xdd9   :  { %v753_v35 = vpop.eup %752 }
 0xdda   :  { %v559_v36 = vmul.f32 %v753_v35, %v517_v34  ;;  %v592_v57 = vpop.permute.xlu0 %591 }
 0xddf   :  { %568 = vperm.xlu1 %734, %v559_v36  }
 0xde3   :  { %581 = vperm.xlu1 %734, %v519_v37  }
 0xe5b   :  { %v548_v39 = vpop.xlane.xlu1 %547 }
 0xe5c   :  { %v551_v40 = vmul.f32 0.03125, %v548_v39 }
 0xe5e   :  { %v554_v41 = vadd.f32 1e-05, %v551_v40 }
 0xe5f   :  { %v569_v42 = vpop.permute.xlu1 %568 }
 0xe60   :  { %754 = vrsqrt.f32 %v554_v41  ;;  %v577_v43 = vmul.f32 %v569_v42, %v535_v12 }
 0xe62   :  { %v595_v46 = vadd.f32 %v587_v44, %v577_v43 }
 0xe63   :  { %v582_v47 = vpop.permute.xlu1 %581 }
 0xe64   :  { %v594_v48 = vadd.f32 %v582_v47, %v576_v45  ;;  %v598_v49 = vmax.f32 %v595_v46, 0.0 }
 0xe66   :  { %v597_v50 = vmax.f32 %v594_v48, 0.0 }
 0xe68   :  { %v602_v51 = vpack.c.bf16 %v598_v49, %v597_v50 }
 0xe6a   :  { %v755_v53 = vpop.eup %754  ;;  %719 = vmatpush3.bf16.msra.mxu0 %v602_v51 }
 0xe6b   :  { %v560_v54 = vmul.f32 %v755_v53, %v518_v52  ;;  %720 = vmatprep.subr.bf16.mxu0 %v757_v31 }
 0xe6d   :  { %573 = vperm.xlu1 %734, %v560_v54  }
 0xeec   :  { %v574_v55 = vpop.permute.xlu1 %573 }
 0xeed   :  { %v578_v56 = vmul.f32 %v574_v55, %v536_v27 }
 0xeef   :  { %v596_v58 = vadd.f32 %v592_v57, %v578_v56 }
 0xef1   :  { %v599_v59 = vmax.f32 %v596_v58, 0.0 }
 0xef3   :  { %v603_v60 = vpack.c.bf16 %v599_v59, %v599_v59 }
 0xef5   :  { %v613_v61 = vsel %vm236_vm10, %v603_v60, 0 }
 0xef6   :  { %721 = vmatpush3.bf16.msra.mxu0 %v613_v61 }
 0xef9   :  { %723 = vmatmul.mubr.msk.bf16.vlgmr.msra.gmra.mrb[8].mxu0 %vm232_vm11, %v735_v62 }
 0xfcc   :  { %v649_v63 = vpop.f32.mrb[8].mxu0 }
 0xfcd   :  { %656 = vst.msk [vmem:[%s1069_s18] sm:$0xff] %vm62_vm0, %v649_v63  ;;  %v724_v31 = vpop.f32.mrb[9].mxu0 }
 0xfce   :  { %v652_v5 = vpop.f32.mrb[10].mxu0 }
 0xfcf   :  { %657 = vst.msk [vmem:[%s1069_s18 + $0x8] sm:$0xf] %vm280_vm12, %v652_v5  ;;  %v725_v4 = vpop.f32.mrb[11].mxu0 }

// kernel: densenet_forward.7
= control target key start
LH: loop header
LB: loop body
LE: loop exit
PB: predicated region body
PF: predicated region fallthrough
CT: control target
= control target key end

     0   :  { %vm53_vm0 = vcmask 130048   ;;  %vm55_vm1 = vcmask 125952   ;;  %v546_v16 = vmov 0   ;;  %v547_v31 = vmov 0.0   ;;  %s549_s25 = smov 16   ;;  %s788_s0 = inlined_call_operand.vmem [shape: f32[12,16], index: 0, kind: input, shape index: {}]   ;;  %s789_s15 = inlined_call_operand.vmem [shape: f32[20,16], index: 15, kind: output, shape index: {}]   ;;  %s790_s4 = inlined_call_operand.vmem [shape: f32[12,1], index: 4, kind: input, shape index: {}]   ;;  %s791_s3 = inlined_call_operand.vmem [shape: f32[12,1], index: 3, kind: input, shape index: {}]   ;;  %s792_s5 = inlined_call_operand.vmem [shape: bf16[8,12], index: 5, kind: input, shape index: {}]   ;;  %s793_s7 = inlined_call_operand.vmem [shape: f32[8,1], index: 7, kind: input, shape index: {}]   ;;  %s794_s6 = inlined_call_operand.vmem [shape: f32[8,1], index: 6, kind: input, shape index: {}]   ;;  %s795_s1 = inlined_call_operand.vmem [shape: f32[1,16], index: 1, kind: input, shape index: {}]   ;;  %s796_s2 = inlined_call_operand.vmem [shape: f32[1,16], index: 2, kind: input, shape index: {}]   ;;  %s797_s8 = inlined_call_operand.vmem [shape: bf16[4,24], index: 8, kind: input, shape index: {}]   ;;  %s798_s9 = inlined_call_operand.vmem [shape: f32[16,1], index: 9, kind: input, shape index: {}]   ;;  %s799_s10 = inlined_call_operand.vmem [shape: f32[16,1], index: 10, kind: input, shape index: {}]   ;;  %s800_s11 = inlined_call_operand.vmem [shape: bf16[8,16], index: 11, kind: input, shape index: {}]   ;;  %s801_s13 = inlined_call_operand.vmem [shape: f32[8,1], index: 13, kind: input, shape index: {}]   ;;  %s802_s12 = inlined_call_operand.vmem [shape: f32[8,1], index: 12, kind: input, shape index: {}]   ;;  %s803_s14 = inlined_call_operand.vmem [shape: bf16[4,24], index: 14, kind: input, shape index: {}]  }
   0x1   :  { %v51_v0 = vld [vmem:[%s788_s0] sm:$0xff]  ;;  %v52_v1 = vld [vmem:[%s788_s0 + $0x8] sm:$0xf]  ;;  %533 = vset.pattern.permute.xlu1 %v546_v16  ;;  %532 = vset.pattern.permute.xlu0 %v546_v16  ;;  %vm548_vm2 = vmmov 0   ;;  %vm125_vm3 = vcmask 1045504   ;;  %vm121_vm4 = vcmask 97280  }
   0x2   :  { %54 = vst.msk [vmem:[%s789_s15] sm:$0xff] %vm53_vm0, %v51_v0  ;;  %v65_v17 = vld [vmem:[%s790_s4] sm:$0xff]  ;;  %v64_v27 = vld [vmem:[%s791_s3 + $0x8] sm:$0xf]  ;;  %497 = vmatprep.subr.bf16.mxu0 %v547_v31  ;;  %503 = vmatprep.subr.bf16.mxu1 %v547_v31  ;;  %vm197_vm5 = vcmask 1047680   ;;  %vm552_vm9 = vmmov 1  }
   0x3   :  { %56 = vst.msk [vmem:[%s789_s15 + $0x8] sm:$0xf] %vm55_vm1, %v52_v1  ;;  %v63_v24 = vld [vmem:[%s791_s3] sm:$0xff]  ;;  %v66_v30 = vld [vmem:[%s790_s4 + $0x8] sm:$0xf]  ;;  %499 = vmatprep.mubr.msk.bf16.mxu0 %vm548_vm2, %v547_v31  ;;  %507 = vmatprep.mubr.msk.bf16.mxu1 %vm548_vm2, %v547_v31  ;;  %vm232_vm12 = vcmask 1043456  }
   0x4   :  { %v119_v44 = vld [vmem:[%s792_s5] sm:$0xf]  ;;  %vm228_vm13 = vcmask 195584  }
   0x5   :  { %v170_v55 = vld [vmem:[%s793_s7] sm:$0xff]  ;;  %s551_s7 = smov 127  }
   0x6   :  { %v169_v59 = vld [vmem:[%s794_s6] sm:$0xff]  ;;  %s550_s6 = smov 113  }
   0x9   :  { %v650_v2 = vld [vmem:[%s789_s15] sm:$0xff] }
   0xa   :  { %v62_v3 = vld [vmem:[%s789_s15 + $0x8] sm:$0xf]  ;;  %v657_v4 = vsel %vm53_vm0, %v650_v2, 0.0 }
   0xb   :  { %68 = vadd.xlane.f32.xlu0 %v657_v4  ;;  %v70_v5 = vsel %vm55_vm1, %v62_v3, 0.0 }
   0xf   :  { %71 = vadd.xlane.f32.xlu0 %v70_v5 }
  0x98   :  { %v69_v6 = vpop.xlane.xlu0 %68 }
  0x99   :  { %v73_v7 = vmul.f32 0.0625, %v69_v6 }
  0x9b   :  { %v75_v8 = vsub.f32 %v650_v2, %v73_v7 }
  0x9c   :  { %v72_v9 = vpop.xlane.xlu0 %71 }
  0x9d   :  { %v74_v10 = vmul.f32 0.0625, %v72_v9  ;;  %v77_v11 = vmul.f32 %v75_v8, %v75_v8  ;;  %v205_v9 = vlaneseq }
  0x9f   :  { %v76_v12 = vsub.f32 %v62_v3, %v74_v10  ;;  %v79_v13 = vsel %vm53_vm0, %v77_v11, 0.0  ;;  %v57_v10 = vld [vmem:[%s795_s1] sm:$0x1]  ;;  %v206_v11 = vshrl.u32 %v205_v9, 7 }
  0xa0   :  { %80 = vadd.xlane.f32.xlu1 %v79_v13  ;;  %vm58_vm6 = vcmp.gt.f32.partialorder %v57_v10, 0.5  ;;  %v59_v13 = vld [vmem:[%s796_s2] sm:$0x1] }
  0xa1   :  { %v78_v14 = vmul.f32 %v76_v12, %v76_v12  ;;  %vm60_vm7 = vcmp.gt.f32.partialorder %v59_v13, 0.5  ;;  %v381_v10 = vld [vmem:[%s801_s13] sm:$0xff] }
  0xa3   :  { %v82_v15 = vsel %vm55_vm1, %v78_v14, 0.0  ;;  %v204_v14 = vsel %vm58_vm6, 1, %v546_v16 }
  0xa4   :  { %83 = vadd.xlane.f32.xlu1 %v82_v15 }
  0xb5   :  { %107 = vperm.xlu1 %533, %v65_v17   ;;  %v215_v17 = vsel %vm60_vm7, 1, %v546_v16 }
 0x12d   :  { %v81_v18 = vpop.xlane.xlu1 %80 }
 0x12e   :  { %v85_v19 = vmul.f32 0.0625, %v81_v18 }
 0x130   :  { %v87_v20 = vadd.f32 1e-05, %v85_v19 }
 0x131   :  { %v84_v21 = vpop.xlane.xlu1 %83 }
 0x132   :  { %534 = vrsqrt.f32 %v87_v20  ;;  %v86_v22 = vmul.f32 0.0625, %v84_v21 }
 0x134   :  { %v88_v23 = vadd.f32 1e-05, %v86_v22 }
 0x135   :  { %v108_v32 = vpop.permute.xlu1 %107 }
 0x136   :  { %536 = vrsqrt.f32 %v88_v23 }
 0x13c   :  { %v535_v25 = vpop.eup %534 }
 0x13d   :  { %v91_v26 = vmul.f32 %v535_v25, %v63_v24  ;;  %v225_v24 = vld [vmem:[%s797_s8] sm:$0x3] }
 0x13f   :  { %95 = vperm.xlu0 %532, %v91_v26  }
 0x140   :  { %v537_v28 = vpop.eup %536 }
 0x141   :  { %v92_v29 = vmul.f32 %v537_v28, %v64_v27 }
 0x143   :  { %100 = vperm.xlu1 %533, %v92_v29  }
 0x147   :  { %112 = vperm.xlu1 %533, %v66_v30  }
 0x1be   :  { %v96_v33 = vpop.permute.xlu0 %95 }
 0x1bf   :  { %v103_v34 = vmul.f32 %v96_v33, %v75_v8 }
 0x1c1   :  { %v115_v36 = vadd.f32 %v108_v32, %v103_v34 }
 0x1c2   :  { %v101_v35 = vpop.permute.xlu1 %100 }
 0x1c3   :  { %v104_v37 = vmul.f32 %v101_v35, %v76_v12  ;;  %v117_v40 = vmax.f32 %v115_v36, 0.0  ;;  %v207_v12 = vsub.s32 0, %v206_v11 }
 0x1c5   :  { %v208_v15 = vrot.slane %v204_v14, %v207_v12 }
 0x1c6   :  { %v113_v38 = vpop.permute.xlu1 %112 }
 0x1c7   :  { %v116_v39 = vadd.f32 %v113_v38, %v104_v37  ;;  %vm209_vm8 = vcmp.eq.s32.totalorder %v208_v15, 1 }
 0x1c8   :  { %vm715_vm10 = vmpackc.low %vm552_vm9, %vm209_vm8 }
 0x1c9   :  { %v118_v41 = vmax.f32 %v116_v39, 0.0 }
 0x1cb   :  { %v120_v42 = vpack.c.bf16 %v118_v41, %v117_v40 }
 0x1cd   :  { %v127_v43 = vsel %vm125_vm3, %v120_v42, 0 }
 0x1ce   :  { %498 = vmatpush3.bf16.msra.mxu0 %v127_v43 }
 0x1cf   :  { %511 = vmatprep.subr.bf16.mxu0 %v547_v31 }
 0x1d1   :  { %500 = vmatmul.mubr.msk.bf16.vlgmr.msra.gmra.mrb[0].mxu0 %vm121_vm4, %v119_v44  ;;  %v279_v44 = vld [vmem:[%s798_s9] sm:$0xff] }
 0x1d2   :  { %513 = vmatprep.mubr.msk.bf16.mxu0 %vm548_vm2, %v547_v31 }
 0x2a4   :  { %v163_v45 = vpop.f32.mrb[0].mxu0 }
 0x2a5   :  { %v501_v46 = vpop.f32.mrb[1].mxu0  ;;  %v171_v47 = vsel %vm53_vm0, %v163_v45, 0.0 }
 0x2a6   :  { %172 = vadd.xlane.f32.xlu1 %v171_v47  ;;  %v166_v48 = vpop.f32.mrb[2].mxu0  ;;  %v282_v47 = vld [vmem:[%s799_s10 + $0x8] sm:$0xff] }
 0x2a7   :  { %v502_v49 = vpop.f32.mrb[3].mxu0 }
 0x333   :  { %v173_v50 = vpop.xlane.xlu1 %172 }
 0x334   :  { %v174_v51 = vmul.f32 0.0625, %v173_v50 }
 0x336   :  { %v175_v52 = vsub.f32 %v163_v45, %v174_v51  ;;  %v280_v51 = vld [vmem:[%s798_s9 + $0x8] sm:$0xff] }
 0x338   :  { %v176_v53 = vmul.f32 %v175_v52, %v175_v52 }
 0x33a   :  { %v177_v54 = vsel %vm53_vm0, %v176_v53, 0.0 }
 0x33b   :  { %178 = vadd.xlane.f32.xlu0 %v177_v54  ;;  %v281_v54 = vld [vmem:[%s799_s10] sm:$0xff] }
 0x351   :  { %192 = vperm.xlu0 %532, %v170_v55  }
 0x3c8   :  { %v179_v56 = vpop.xlane.xlu0 %178 }
 0x3c9   :  { %v180_v57 = vmul.f32 0.0625, %v179_v56 }
 0x3cb   :  { %v181_v58 = vadd.f32 1e-05, %v180_v57 }
 0x3cd   :  { %538 = vrsqrt.f32 %v181_v58 }
 0x3d0   :  { %v193_v0 = vpop.permute.xlu0 %192 }
 0x3d7   :  { %v539_v60 = vpop.eup %538 }
 0x3d8   :  { %v183_v61 = vmul.f32 %v539_v60, %v169_v59 }
 0x3da   :  { %186 = vperm.xlu1 %533, %v183_v61  }
 0x459   :  { %v187_v62 = vpop.permute.xlu1 %186 }
 0x45a   :  { %v189_v63 = vmul.f32 %v187_v62, %v175_v52 }
 0x45c   :  { %v195_v1 = vadd.f32 %v193_v0, %v189_v63 }
 0x45e   :  { %v196_v3 = vmax.f32 %v195_v1, 0.0 }
 0x460   :  { %198 = vrot.lane.b32.xlu1 %v196_v3, %s549_s25 }
 0x4d2   :  { %v199_v5 = vpop.permute.xlu1 %198 }
 0x4d3   :  { %v200_v6 = vsel %vm197_vm5, %v199_v5, %v196_v3 }
 0x4d4   :  { %201 = vrot.lane.b32.xlu1 %v200_v6, %s549_s25 }
 0x546   :  { %v202_v7 = vpop.permute.xlu1 %201 }
 0x547   :  { %v203_v8 = vsel %vm197_vm5, %v202_v7, %v196_v3 }
 0x548   :  { %211 = vrot.lane.b32.xlu1 %v203_v8, %s550_s6 }
 0x54c   :  { %221 = vrot.lane.b32.xlu1 %v203_v8, %s551_s7 }
 0x570   :  { %284 = vadd.xlane.f32.xlu1 %v657_v4  ;;  %v713_v4 = vrot.slane %v215_v17, %v207_v12 }
 0x572   :  { %vm220_vm11 = vcmp.eq.s32.totalorder %v713_v4, 1 }
 0x5ba   :  { %v212_v18 = vpop.permute.xlu1 %211 }
 0x5bb   :  { %v479_v20 = vpack.c.bf16 %v196_v3, %v212_v18  ;;  %v335_v3 = vld [vmem:[%s800_s11] sm:$0xf] }
 0x5bd   :  { %504 = vmatpush3.bf16.msk.msra.mxu1 %vm715_vm10, %v479_v20 }
 0x5be   :  { %v222_v21 = vpop.permute.xlu1 %221  ;;  %505 = vmatprep.subr.bf16.mxu1 %v547_v31 }
 0x5bf   :  { %v224_v16 = vsel %vm220_vm11, %v222_v21, 0.0  ;;  %v380_v21 = vld [vmem:[%s802_s12] sm:$0xff] }
 0x5c0   :  { %v227_v22 = vpack.c.bf16 %v224_v16, %v224_v16 }
 0x5c2   :  { %v234_v23 = vsel %vm232_vm12, %v227_v22, 0 }
 0x5c3   :  { %506 = vmatpush3.bf16.msra.mxu1 %v234_v23 }
 0x5c4   :  { %517 = vmatprep.subr.bf16.mxu1 %v547_v31 }
 0x5c6   :  { %508 = vmatmul.mubr.msk.bf16.vlgmr.msra.gmra.mrb[0].mxu1 %vm228_vm13, %v225_v24 }
 0x5c7   :  { %521 = vmatprep.mubr.msk.bf16.mxu1 %vm548_vm2, %v547_v31 }
 0x5fd   :  { %v285_v25 = vpop.xlane.xlu1 %284 }
 0x5fe   :  { %v289_v26 = vmul.f32 0.0625, %v285_v25 }
 0x600   :  { %v291_v32 = vsub.f32 %v650_v2, %v289_v26 }
 0x602   :  { %v293_v33 = vmul.f32 %v291_v32, %v291_v32 }
 0x604   :  { %v295_v36 = vsel %vm53_vm0, %v293_v33, 0.0 }
 0x699   :  { %v270_v27 = vpop.f32.mrb[0].mxu1 }
 0x69a   :  { %276 = vst.msk [vmem:[%s789_s15 + $0xc] sm:$0xf] %vm55_vm1, %v270_v27  ;;  %v509_v28 = vpop.f32.mrb[1].mxu1 }
 0x69b   :  { %v273_v29 = vpop.f32.mrb[2].mxu1 }
 0x69c   :  { %v510_v30 = vpop.f32.mrb[3].mxu1 }
 0x6a1   :  { %v278_v34 = vld [vmem:[%s789_s15 + $0x8] sm:$0xff] }
 0x6a2   :  { %v286_v35 = vsel %vm53_vm0, %v278_v34, 0.0 }
 0x6a3   :  { %287 = vadd.xlane.f32.xlu0 %v286_v35 }
 0x6a7   :  { %296 = vadd.xlane.f32.xlu0 %v295_v36 }
 0x730   :  { %v288_v37 = vpop.xlane.xlu0 %287 }
 0x731   :  { %v290_v38 = vmul.f32 0.0625, %v288_v37 }
 0x733   :  { %v292_v39 = vsub.f32 %v278_v34, %v290_v38 }
 0x734   :  { %v297_v40 = vpop.xlane.xlu0 %296 }
 0x735   :  { %v301_v41 = vmul.f32 0.0625, %v297_v40  ;;  %v294_v42 = vmul.f32 %v292_v39, %v292_v39 }
 0x737   :  { %v303_v43 = vadd.f32 1e-05, %v301_v41  ;;  %v298_v2 = vsel %vm53_vm0, %v294_v42, 0.0 }
 0x738   :  { %299 = vadd.xlane.f32.xlu1 %v298_v2 }
 0x739   :  { %540 = vrsqrt.f32 %v303_v43 }
 0x743   :  { %v541_v45 = vpop.eup %540 }
 0x744   :  { %v307_v46 = vmul.f32 %v541_v45, %v279_v44 }
 0x746   :  { %311 = vperm.xlu0 %532, %v307_v46  }
 0x74a   :  { %328 = vperm.xlu0 %532, %v282_v47  }
 0x7c5   :  { %v300_v48 = vpop.xlane.xlu1 %299  ;;  %v312_v55 = vpop.permute.xlu0 %311 }
 0x7c6   :  { %v302_v49 = vmul.f32 0.0625, %v300_v48  ;;  %v319_v59 = vmul.f32 %v312_v55, %v291_v32 }
 0x7c8   :  { %v304_v50 = vadd.f32 1e-05, %v302_v49 }
 0x7c9   :  { %v329_v58 = vpop.permute.xlu0 %328 }
 0x7ca   :  { %542 = vrsqrt.f32 %v304_v50 }
 0x7d4   :  { %v543_v52 = vpop.eup %542 }
 0x7d5   :  { %v308_v53 = vmul.f32 %v543_v52, %v280_v51 }
 0x7d7   :  { %316 = vperm.xlu1 %533, %v308_v53  }
 0x7db   :  { %323 = vperm.xlu1 %533, %v281_v54  }
 0x856   :  { %v317_v56 = vpop.permute.xlu1 %316 }
 0x857   :  { %v320_v57 = vmul.f32 %v317_v56, %v292_v39  ;;  %v423_v39 = vld [vmem:[%s803_s14] sm:$0x3] }
 0x859   :  { %v332_v60 = vadd.f32 %v329_v58, %v320_v57 }
 0x85a   :  { %v324_v61 = vpop.permute.xlu1 %323 }
 0x85b   :  { %v331_v62 = vadd.f32 %v324_v61, %v319_v59  ;;  %v334_v63 = vmax.f32 %v332_v60, 0.0 }
 0x85d   :  { %v333_v0 = vmax.f32 %v331_v62, 0.0 }
 0x85f   :  { %v336_v1 = vpack.c.bf16 %v334_v63, %v333_v0 }
 0x861   :  { %512 = vmatpush3.bf16.msra.mxu0 %v336_v1 }
 0x864   :  { %514 = vmatmul.mubr.msk.bf16.vlgmr.msra.gmra.mrb[4].mxu0 %vm53_vm0, %v335_v3 }
 0x937   :  { %v374_v5 = vpop.f32.mrb[4].mxu0 }
 0x938   :  { %v382_v6 = vsel %vm53_vm0, %v374_v5, 0.0  ;;  %v515_v7 = vpop.f32.mrb[5].mxu0 }
 0x939   :  { %383 = vadd.xlane.f32.xlu1 %v382_v6  ;;  %v377_v8 = vpop.f32.mrb[6].mxu0 }
 0x93a   :  { %v516_v9 = vpop.f32.mrb[7].mxu0 }
 0x94a   :  { %403 = vperm.xlu1 %533, %v381_v10  }
 0x9c6   :  { %v384_v11 = vpop.xlane.xlu1 %383 }
 0x9c7   :  { %v385_v12 = vmul.f32 0.0625, %v384_v11 }
 0x9c9   :  { %v386_v13 = vsub.f32 %v374_v5, %v385_v12 }
 0x9ca   :  { %v404_v25 = vpop.permute.xlu1 %403 }
 0x9cb   :  { %v387_v14 = vmul.f32 %v386_v13, %v386_v13 }
 0x9cd   :  { %v388_v15 = vsel %vm53_vm0, %v387_v14, 0.0 }
 0x9ce   :  { %389 = vadd.xlane.f32.xlu0 %v388_v15 }
 0xa5b   :  { %v390_v17 = vpop.xlane.xlu0 %389 }
 0xa5c   :  { %v391_v18 = vmul.f32 0.0625, %v390_v17 }
 0xa5e   :  { %v392_v20 = vadd.f32 1e-05, %v391_v18 }
 0xa60   :  { %544 = vrsqrt.f32 %v392_v20 }
 0xa6a   :  { %v545_v16 = vpop.eup %544 }
 0xa6b   :  { %v394_v22 = vmul.f32 %v545_v16, %v380_v21 }
 0xa6d   :  { %397 = vperm.xlu0 %532, %v394_v22  }
 0xaec   :  { %v398_v23 = vpop.permute.xlu0 %397 }
 0xaed   :  { %v400_v24 = vmul.f32 %v398_v23, %v386_v13 }
 0xaef   :  { %v406_v26 = vadd.f32 %v404_v25, %v400_v24 }
 0xaf1   :  { %v407_v27 = vmax.f32 %v406_v26, 0.0 }
 0xaf3   :  { %408 = vrot.lane.b32.xlu1 %v407_v27, %s549_s25 }
 0xb65   :  { %v409_v28 = vpop.permute.xlu1 %408 }
 0xb66   :  { %v410_v29 = vsel %vm197_vm5, %v409_v28, %v407_v27 }
 0xb67   :  { %411 = vrot.lane.b32.xlu0 %v410_v29, %s549_s25 }
 0xbd9   :  { %v412_v30 = vpop.permute.xlu0 %411 }
 0xbda   :  { %v413_v32 = vsel %vm197_vm5, %v412_v30, %v407_v27 }
 0xbdb   :  { %419 = vrot.lane.b32.xlu0 %v413_v32, %s551_s7  ;;  %415 = vrot.lane.b32.xlu1 %v413_v32, %s550_s6 }
 0xc4d   :  { %v420_v33 = vpop.permute.xlu0 %419  ;;  %v416_v34 = vpop.permute.xlu1 %415 }
 0xc4e   :  { %v422_v35 = vsel %vm220_vm11, %v420_v33, 0.0  ;;  %v484_v36 = vpack.c.bf16 %v407_v27, %v416_v34 }
 0xc4f   :  { %v425_v37 = vpack.c.bf16 %v422_v35, %v422_v35 }
 0xc50   :  { %518 = vmatpush3.bf16.msk.msra.mxu1 %vm715_vm10, %v484_v36 }
 0xc51   :  { %519 = vmatprep.subr.bf16.mxu1 %v547_v31  ;;  %v430_v38 = vsel %vm232_vm12, %v425_v37, 0 }
 0xc54   :  { %520 = vmatpush3.bf16.msra.mxu1 %v430_v38 }
 0xc57   :  { %522 = vmatmul.mubr.msk.bf16.vlgmr.msra.gmra.mrb[4].mxu1 %vm228_vm13, %v423_v39 }
 0xd2a   :  { %v466_v40 = vpop.f32.mrb[4].mxu1 }
 0xd2b   :  { %472 = vst.msk [vmem:[%s789_s15 + $0x10] sm:$0xf] %vm55_vm1, %v466_v40  ;;  %v523_v4 = vpop.f32.mrb[5].mxu1 }
 0xd2c   :  { %v469_v19 = vpop.f32.mrb[6].mxu1 }
 0xd2d   :  { %v524_v41 = vpop.f32.mrb[7].mxu1 }

// kernel: densenet_forward.9
= control target key start
LH: loop header
LB: loop body
LE: loop exit
PB: predicated region body
PF: predicated region fallthrough
CT: control target
= control target key end

     0   :  { %v158_v1 = vmov 0.0   ;;  %vm159_vm0 = vmmov 0   ;;  %s208_s0 = inlined_call_operand.vmem [shape: f32[2,40], index: 0, kind: input, shape index: {}]   ;;  %s209_s1 = inlined_call_operand.vmem [shape: bf16[40,16], index: 1, kind: input, shape index: {}]   ;;  %s210_s2 = inlined_call_operand.vmem [shape: f32[1,16], index: 2, kind: input, shape index: {}]   ;;  %s211_s3 = inlined_call_operand.hbm [shape: f32[2,16], index: 3, kind: output, shape index: {}]  }
   0x1   :  { %v131_v0 = vld [vmem:[%s209_s1] sm:$0xff]   ;;  %118 = vmatprep.subr.bf16.mxu0 %v158_v1  ;;  %v132_v2 = vld [vmem:[%s209_s1 + $0x8] sm:$0xff]   ;;  %v133_v3 = vld [vmem:[%s209_s1 + $0x10] ss:$0 sps:$4 sm:$0xff]   ;;  %124 = vmatprep.mubr.msk.bf16.mxu0 %vm159_vm0, %v158_v1 }
   0x2   :  { %119 = vmatpush3.bf16.msra.mxu0 %v131_v0 }
   0x3   :  { %120 = vmatprep.subr.bf16.mxu0 %v158_v1 }
   0x4   :  { %8 = vsyncpa [#allocation3], 0  ;;  %vm49_vm1 = vcmask 1043456   ;;  %v16_v4 = vld [vmem:[%s208_s0] sm:$0x3]  ;;  %vm45_vm2 = vcmask 326656  }
   0x5   :  { %v51_v5 = vsel %vm49_vm1, %v133_v3, 0  ;;  %v17_v6 = vpack.c.bf16 %v16_v4, %v16_v4  ;;  %v109_v7 = vld [vmem:[%s210_s2] ss:$0 sm:$0xff]  ;;  %s160_s1 = smov [#allocation2]   ;;  %vm93_vm3 = vcmask 123904  }
   0x6   :  { %121 = vmatpush3.bf16.msra.mxu0 %v132_v2  ;;  %s101_s22 = sshll.u32 %s160_s1, 4  ;;  %s102_s22 = int_to_ptr.vmem [resolvable:$true] %s101_s22 }
   0x7   :  { %122 = vmatprep.subr.bf16.mxu0 %v158_v1  ;;  %s134_s0 = scalar_lea.vmem %s102_s22, 32  ;;  %p139_p1 = scmp.lt.s32.totalorder %s102_s22, %s102_s22 }
   0x8   :  { %p135_p0 = scmp.ne.s32.totalorder %s102_s22, %s134_s0  ;;  %p140_p2 = scmp.lt.s32.totalorder %s134_s0, %s134_s0 }
   0xa   :  { %123 = vmatpush3.bf16.msra.mxu0 %v51_v5  ;;  %p141_p3 = por %p140_p2, %p139_p1 }
   0xc   :  { %p142_p4 = pnand %p141_p3, %p135_p0 }
   0xd   :  { %125 = vmatmul.mubr.msk.bf16.vlgmr.msra.gmra.mrb[0].mxu0 %vm45_vm2, %v17_v6 }
  0xe0   :  { %v87_v8 = vpop.f32.mrb[0].mxu0 }
  0xe1   :  { %v88_v9 = vadd.f32 %v109_v7, %v87_v8  ;;  %v126_v10 = vpop.f32.mrb[1].mxu0 }
  0xe2   :  { %v90_v11 = vpop.f32.mrb[2].mxu0 }
  0xe3   :  { %v127_v12 = vpop.f32.mrb[3].mxu0  ;;  %94 = vst.msk [vmem:[#allocation2] sm:$0x3] %vm93_vm3, %v88_v9 }
  0xe4   :  { %145 = shalt.err (!%p142_p4)
}
  0xe5   :  { %s146_s2 = scalar_lea.hbm %s211_s3, 32 }
  0xe6   :  { %p147_p5 = scmp.ne.s32.totalorder %s211_s3, %s146_s2  ;;  %p150_p6 = scmp.lt.u32.totalorder %s146_s2, %s211_s3 }
  0xe8   :  { %p152_p7 = pnand %p150_p6, %p147_p5 }
  0xea   :  { %155 = shalt.err (!%p152_p7)
}
  0xeb   :  { %104 = dma.vmem_to_hbm [thread:$0]  %s102_s22, 32, %s211_s3, [#allocation3]  }
  0xec   :  { %156 = dma.done.wait [#allocation3], 32  }
  0xed   :  { %157 = vsyncadd [#allocation3], 4294967264 }
  0xee   :  { %108 = vsyncpa [#allocation3], 1 }

</bundles_post_ra>
